<compile_context>
chip_gen: v6e
topology: v6e:2x2x1
jax: 0.10.0
libtpu: 0.0.40
codegen_flags: <defaults>
</compile_context>

<pallas_src>
import functools

import numpy as np
import jax
import jax.numpy as jnp
from jax.experimental import pallas as pl
from jax.experimental.pallas import tpu as pltpu

EYE_WEIGHT = 10.0
_MAX_EYE_H = 64    # static bound on eye-window height (rows)
_MAX_EYE_W = 128   # static bound on eye-window width  (cols, one lane tile)


def _make_kernel(eye_weight, B, C, H, W, E, EH, EW):
    """Builds the per-image loss kernel (all sizes static)."""
    inv_n = 1.0 / float(B * C * H * W)
    eye_scale = float(eye_weight) / float(B)

    def kernel(rbox_ref, tbox_ref, valid_ref, recon_ref, target_ref, out_ref):
        # rbox_ref, tbox_ref : SMEM (B*E*4,) int32 — [x0, y0, x1, y1] per eye
        # valid_ref          : SMEM (B,)     int32 — 1 if landmarks found
        # recon_ref/target_ref: VMEM (1, C, H, W)
        # out_ref            : VMEM (1, 8, 128) f32 — per-image partial sum
        b = pl.program_id(0)

        r = recon_ref[0].astype(jnp.float32)    # (C, H, W)
        t = target_ref[0].astype(jnp.float32)   # (C, H, W)

        # ---- base L1: raw sum; the 1/(B*C*H*W) scale is applied once at the
        # end (hoisted out of the elementwise path). ----
        base_sum = jnp.sum(jnp.abs(r - t))

        # ---- per-eye bounded-window L1 ----
        # iotas for the one-hot gather matrices and the window mask.
        row_out = jax.lax.broadcasted_iota(jnp.int32, (EH, H), 0)   # window row i
        row_src = jax.lax.broadcasted_iota(jnp.int32, (EH, H), 1)   # source row k
        col_src = jax.lax.broadcasted_iota(jnp.int32, (W, EW), 0)   # source col w
        col_out = jax.lax.broadcasted_iota(jnp.int32, (W, EW), 1)   # window col j
        win_i = jax.lax.broadcasted_iota(jnp.int32, (EH, EW), 0)
        win_j = jax.lax.broadcasted_iota(jnp.int32, (EH, EW), 1)

        vld = valid_ref[b].astype(jnp.float32)
        win_acc = jnp.zeros((EH, EW), jnp.float32)

        for e in range(E):                       # E == 2, unrolled
            o = b * (4 * E) + 4 * e
            rx0 = rbox_ref[o + 0]
            ry0 = rbox_ref[o + 1]
            rx1 = rbox_ref[o + 2]
            ry1 = rbox_ref[o + 3]
            tx0 = tbox_ref[o + 0]
            ty0 = tbox_ref[o + 1]
            tx1 = tbox_ref[o + 2]
            ty1 = tbox_ref[o + 3]

            # Matched crop size (truncated to the static window bound).
            min_h = jnp.minimum(jnp.minimum(ry1 - ry0, ty1 - ty0), EH)
            min_w = jnp.minimum(jnp.minimum(rx1 - rx0, tx1 - tx0), EW)

            # One-hot gather matrices: window[i, j] = image[y0 + i, x0 + j].
            # Selection by one-hot matmul is exact in f32 and costs only
            # O(EH*H*W + EH*W*EW) per channel — negligible on the MXU.
            pr_r = (row_src == ry0 + row_out).astype(jnp.float32)   # (EH, H)
            pr_t = (row_src == ty0 + row_out).astype(jnp.float32)
            pc_r = (col_src == rx0 + col_out).astype(jnp.float32)   # (W, EW)
            pc_t = (col_src == tx0 + col_out).astype(jnp.float32)

            # Per-eye weight: eye_weight/B * valid / (C*min_h*min_w).
            # (Empty / degenerate regions contribute 0; the PyTorch reference
            # would produce NaN there.)
            count = (min_h * min_w).astype(jnp.float32) * float(C)
            scale = jnp.where(
                (min_h > 0) & (min_w > 0),
                eye_scale * vld / jnp.maximum(count, 1.0),
                0.0)
            mask = ((win_i < min_h) & (win_j < min_w)).astype(jnp.float32) * scale

            eye_win = jnp.zeros((EH, EW), jnp.float32)
            for c in range(C):                   # C is small, unrolled
                rw = jnp.dot(
                    jnp.dot(pr_r, r[c], preferred_element_type=jnp.float32),
                    pc_r, preferred_element_type=jnp.float32)        # (EH, EW)
                tw = jnp.dot(
                    jnp.dot(pr_t, t[c], preferred_element_type=jnp.float32),
                    pc_t, preferred_element_type=jnp.float32)        # (EH, EW)
                eye_win = eye_win + jnp.abs(rw - tw)
            win_acc = win_acc + eye_win * mask

        partial = base_sum * inv_n + jnp.sum(win_acc)
        # Lane-dense full-block store; the wrapper reads [b, 0, 0].
        out_ref[...] = jnp.broadcast_to(partial, out_ref.shape)

    return kernel


def _pallas_loss(recon, target, rbox_flat, tbox_flat, valid, eye_weight):
    B, C, H, W = recon.shape
    E = rbox_flat.shape[0] // (B * 4)
    EH = min(_MAX_EYE_H, H)
    EW = min(_MAX_EYE_W, W)
    kernel = _make_kernel(float(eye_weight), B, C, H, W, E, EH, EW)

    # VMEM budget: 2 inputs x 2 pipeline buffers per grid step + f32 temps.
    # Only raise the scoped limit when the 32 MiB default would be exceeded
    # (keeps headroom on v7x's 64 MiB physical VMEM for typical image sizes).
    img_bytes = C * H * W * recon.dtype.itemsize
    est_vmem = 2 * 2 * img_bytes + 3 * C * H * W * 4 + (2 << 20)
    vmem_limit = min(int(est_vmem), 100 << 20) if est_vmem > (32 << 20) else None

    out = pl.pallas_call(
        kernel,
        out_shape=jax.ShapeDtypeStruct((B, 8, 128), jnp.float32),
        grid_spec=pltpu.PrefetchScalarGridSpec(
            num_scalar_prefetch=3,            # rbox, tbox, valid -> SMEM
            grid=(B,),
            in_specs=[
                pl.BlockSpec((1, C, H, W), lambda b, rb, tb, v: (b, 0, 0, 0)),
                pl.BlockSpec((1, C, H, W), lambda b, rb, tb, v: (b, 0, 0, 0)),
            ],
            out_specs=pl.BlockSpec((1, 8, 128), lambda b, rb, tb, v: (b, 0, 0)),
        ),
        compiler_params=pltpu.CompilerParams(
            dimension_semantics=("parallel",),   # independent per-image blocks
            vmem_limit_bytes=vmem_limit,
        ),
    )(rbox_flat, tbox_flat, valid, recon, target)

    # Tiny final reduction over the per-image partial sums.
    return jnp.sum(out[:, 0, 0])


@functools.partial(jax.jit, static_argnames=("eye_weight",))
def mediapipe_eye_enhancement_loss(recon, target, recon_boxes, target_boxes, valid,
                                   eye_weight=EYE_WEIGHT):
    """Forward pass of MediaPipeEyeEnhancementLoss.

    recon, target: (B, C, H, W) float
    recon_boxes, target_boxes: (B, E, 4) int32 — [x_min, y_min, x_max, y_max]
    valid: (B,) int32 — 1 if a face/landmarks were found for that image else 0
    """
    # TODO(synk): MediaPipe FaceMesh landmark detection has no Pallas/JAX
    # equivalent; eye boxes + validity flags are taken as inputs instead.
    B, C, H, W = recon.shape
    E = recon_boxes.shape[1]
    # Clamp boxes to image bounds (the PyTorch reference clamps via slicing).
    lim = jnp.array([W, H, W, H], dtype=jnp.int32)
    rb = jnp.clip(recon_boxes.astype(jnp.int32), 0, lim)
    tb = jnp.clip(target_boxes.astype(jnp.int32), 0, lim)
    rbox_flat = rb.reshape(B * E * 4)
    tbox_flat = tb.reshape(B * E * 4)
    valid = valid.astype(jnp.int32).reshape(B)
    return _pallas_loss(recon, target, rbox_flat, tbox_flat, valid, float(eye_weight))


def _reference_loss(recon, target, recon_boxes, target_boxes, valid, eye_weight):
    """Pure-numpy reference mirroring the PyTorch forward (given the boxes)."""
    recon = np.asarray(recon, dtype=np.float32)
    target = np.asarray(target, dtype=np.float32)
    base = np.mean(np.abs(recon - target))
    B = recon.shape[0]
    eye_loss = 0.0
    for i in range(B):
        if not valid[i]:
            continue
        for e in range(recon_boxes.shape[1]):
            rx0, ry0, rx1, ry1 = recon_boxes[i, e]
            tx0, ty0, tx1, ty1 = target_boxes[i, e]
            rr = recon[i, :, ry0:ry1, rx0:rx1]
            tt = target[i, :, ty0:ty1, tx0:tx1]
            mh = min(rr.shape[1], tt.shape[1])
            mw = min(rr.shape[2], tt.shape[2])
            rr = rr[:, :mh, :mw]
            tt = tt[:, :mh, :mw]
            eye_loss += np.mean(np.abs(rr - tt))
    eye_loss /= B
    return base + eye_weight * eye_loss


if __name__ == "__main__":
    B, C, H, W = 2, 4, 16, 16
    key = jax.random.PRNGKey(0)
    k1, k2 = jax.random.split(key)
    recon = jax.random.uniform(k1, (B, C, H, W), dtype=jnp.float32)
    target = jax.random.uniform(k2, (B, C, H, W), dtype=jnp.float32)

    # Deterministic synthetic "MediaPipe" eye boxes: [x_min, y_min, x_max, y_max].
    recon_boxes = np.array(
        [[[3, 4, 9, 8], [10, 4, 15, 9]],
         [[2, 3, 8, 7], [9, 5, 14, 10]]], dtype=np.int32)
    target_boxes = np.array(
        [[[4, 5, 9, 9], [10, 3, 14, 8]],
         [[2, 4, 9, 8], [8, 5, 13, 9]]], dtype=np.int32)
    valid = np.array([1, 1], dtype=np.int32)

    loss = mediapipe_eye_enhancement_loss(
        recon, target,
        jnp.asarray(recon_boxes), jnp.asarray(target_boxes), jnp.asarray(valid),
        eye_weight=EYE_WEIGHT)
    loss = jax.block_until_ready(loss)

    ref = _reference_loss(recon, target, recon_boxes, target_boxes, valid, EYE_WEIGHT)
    np.testing.assert_allclose(np.asarray(loss), ref, rtol=1e-5, atol=1e-5)

    print("KERNEL_OK")
</pallas_src>

<mosaic_0001>
module attributes {stable_mosaic.version = 11 : i64} {
  func.func @kernel(%arg0: i32, %arg1: memref<16xi32, #tpu.memory_space<smem>>, %arg2: memref<16xi32, #tpu.memory_space<smem>>, %arg3: memref<2xi32, #tpu.memory_space<smem>>, %arg4: memref<1x4x16x16xf32, #tpu.memory_space<vmem>>, %arg5: memref<1x4x16x16xf32, #tpu.memory_space<vmem>>, %arg6: memref<1x8x128xf32, #tpu.memory_space<vmem>>) attributes {dimension_semantics = [#tpu.dimension_semantics<parallel>], iteration_bounds = array<i64: 2>, scalar_prefetch = 3 : i64, scratch_operands = 0 : i64, tpu.core_type = #tpu.core_type<tc>, window_params = [{transform_indices = @transform_0, window_bounds = array<i64: 1, 4, 16, 16>}, {transform_indices = @transform_1, window_bounds = array<i64: 1, 4, 16, 16>}, {transform_indices = @transform_2, window_bounds = array<i64: 1, 8, 128>}]} {
    %c0 = arith.constant 0 : index
    %c0_0 = arith.constant 0 : index
    %c0_1 = arith.constant 0 : index
    %c0_2 = arith.constant 0 : index
    %0 = vector.load %arg4[%c0, %c0_0, %c0_1, %c0_2] : memref<1x4x16x16xf32, #tpu.memory_space<vmem>>, vector<1x4x16x16xf32>
    %1 = vector.shape_cast %0 : vector<1x4x16x16xf32> to vector<4x16x16xf32>
    %c0_3 = arith.constant 0 : index
    %c0_4 = arith.constant 0 : index
    %c0_5 = arith.constant 0 : index
    %c0_6 = arith.constant 0 : index
    %2 = vector.load %arg5[%c0_3, %c0_4, %c0_5, %c0_6] : memref<1x4x16x16xf32, #tpu.memory_space<vmem>>, vector<1x4x16x16xf32>
    %3 = vector.shape_cast %2 : vector<1x4x16x16xf32> to vector<4x16x16xf32>
    %4 = arith.subf %1, %3 : vector<4x16x16xf32>
    %5 = math.absf %4 : vector<4x16x16xf32>
    %6 = vector.shape_cast %5 : vector<4x16x16xf32> to vector<1x4x16x16xf32>
    %cst = arith.constant dense<0.000000e+00> : vector<1xf32>
    %7 = vector.multi_reduction <add>, %6, %cst [1, 2, 3] : vector<1x4x16x16xf32> to vector<1xf32>
    %8 = vector.shape_cast %7 : vector<1xf32> to vector<1x1x1x1xf32>
    %9 = vector.extract %8[0, 0, 0, 0] : f32 from vector<1x1x1x1xf32>
    %10 = tpu.iota {dimensions = array<i32: 0>} : vector<16x16xi32>
    %11 = tpu.iota {dimensions = array<i32: 1>} : vector<16x16xi32>
    %12 = tpu.iota {dimensions = array<i32: 0>} : vector<16x16xi32>
    %13 = tpu.iota {dimensions = array<i32: 1>} : vector<16x16xi32>
    %14 = tpu.iota {dimensions = array<i32: 0>} : vector<16x16xi32>
    %15 = tpu.iota {dimensions = array<i32: 1>} : vector<16x16xi32>
    %16 = arith.index_cast %arg0 : i32 to index
    %17 = memref.load %arg3[%16] : memref<2xi32, #tpu.memory_space<smem>>
    %18 = arith.sitofp %17 : i32 to f32
    %cst_7 = arith.constant 0.000000e+00 : f32
    %19 = vector.broadcast %cst_7 : f32 to vector<16x16xf32>
    %c8_i32 = arith.constant 8 : i32
    %20 = arith.muli %arg0, %c8_i32 : i32
    %c0_i32 = arith.constant 0 : i32
    %21 = arith.addi %20, %c0_i32 : i32
    %c0_i32_8 = arith.constant 0 : i32
    %22 = arith.addi %21, %c0_i32_8 : i32
    %23 = arith.index_cast %22 : i32 to index
    %24 = memref.load %arg1[%23] : memref<16xi32, #tpu.memory_space<smem>>
    %c1_i32 = arith.constant 1 : i32
    %25 = arith.addi %21, %c1_i32 : i32
    %26 = arith.index_cast %25 : i32 to index
    %27 = memref.load %arg1[%26] : memref<16xi32, #tpu.memory_space<smem>>
    %c2_i32 = arith.constant 2 : i32
    %28 = arith.addi %21, %c2_i32 : i32
    %29 = arith.index_cast %28 : i32 to index
    %30 = memref.load %arg1[%29] : memref<16xi32, #tpu.memory_space<smem>>
    %c3_i32 = arith.constant 3 : i32
    %31 = arith.addi %21, %c3_i32 : i32
    %32 = arith.index_cast %31 : i32 to index
    %33 = memref.load %arg1[%32] : memref<16xi32, #tpu.memory_space<smem>>
    %c0_i32_9 = arith.constant 0 : i32
    %34 = arith.addi %21, %c0_i32_9 : i32
    %35 = arith.index_cast %34 : i32 to index
    %36 = memref.load %arg2[%35] : memref<16xi32, #tpu.memory_space<smem>>
    %c1_i32_10 = arith.constant 1 : i32
    %37 = arith.addi %21, %c1_i32_10 : i32
    %38 = arith.index_cast %37 : i32 to index
    %39 = memref.load %arg2[%38] : memref<16xi32, #tpu.memory_space<smem>>
    %c2_i32_11 = arith.constant 2 : i32
    %40 = arith.addi %21, %c2_i32_11 : i32
    %41 = arith.index_cast %40 : i32 to index
    %42 = memref.load %arg2[%41] : memref<16xi32, #tpu.memory_space<smem>>
    %c3_i32_12 = arith.constant 3 : i32
    %43 = arith.addi %21, %c3_i32_12 : i32
    %44 = arith.index_cast %43 : i32 to index
    %45 = memref.load %arg2[%44] : memref<16xi32, #tpu.memory_space<smem>>
    %46 = arith.subi %33, %27 : i32
    %47 = arith.subi %45, %39 : i32
    %48 = arith.minsi %46, %47 : i32
    %c16_i32 = arith.constant 16 : i32
    %49 = arith.minsi %48, %c16_i32 : i32
    %50 = arith.subi %30, %24 : i32
    %51 = arith.subi %42, %36 : i32
    %52 = arith.minsi %50, %51 : i32
    %c16_i32_13 = arith.constant 16 : i32
    %53 = arith.minsi %52, %c16_i32_13 : i32
    %54 = vector.broadcast %27 : i32 to vector<16x16xi32>
    %55 = arith.addi %54, %10 : vector<16x16xi32>
    %56 = arith.cmpi eq, %11, %55 : vector<16x16xi32>
    %57 = arith.extui %56 : vector<16x16xi1> to vector<16x16xi32>
    %58 = arith.sitofp %57 : vector<16x16xi32> to vector<16x16xf32>
    %59 = vector.broadcast %39 : i32 to vector<16x16xi32>
    %60 = arith.addi %59, %10 : vector<16x16xi32>
    %61 = arith.cmpi eq, %11, %60 : vector<16x16xi32>
    %62 = arith.extui %61 : vector<16x16xi1> to vector<16x16xi32>
    %63 = arith.sitofp %62 : vector<16x16xi32> to vector<16x16xf32>
    %64 = vector.broadcast %24 : i32 to vector<16x16xi32>
    %65 = arith.addi %64, %13 : vector<16x16xi32>
    %66 = arith.cmpi eq, %12, %65 : vector<16x16xi32>
    %67 = arith.extui %66 : vector<16x16xi1> to vector<16x16xi32>
    %68 = arith.sitofp %67 : vector<16x16xi32> to vector<16x16xf32>
    %69 = vector.broadcast %36 : i32 to vector<16x16xi32>
    %70 = arith.addi %69, %13 : vector<16x16xi32>
    %71 = arith.cmpi eq, %12, %70 : vector<16x16xi32>
    %72 = arith.extui %71 : vector<16x16xi1> to vector<16x16xi32>
    %73 = arith.sitofp %72 : vector<16x16xi32> to vector<16x16xf32>
    %74 = arith.muli %49, %53 : i32
    %75 = arith.sitofp %74 : i32 to f32
    %cst_14 = arith.constant 4.000000e+00 : f32
    %76 = arith.mulf %75, %cst_14 : f32
    %c0_i32_15 = arith.constant 0 : i32
    %77 = arith.cmpi sgt, %49, %c0_i32_15 : i32
    %c0_i32_16 = arith.constant 0 : i32
    %78 = arith.cmpi sgt, %53, %c0_i32_16 : i32
    %79 = arith.andi %77, %78 : i1
    %cst_17 = arith.constant 5.000000e+00 : f32
    %80 = arith.mulf %cst_17, %18 : f32
    %cst_18 = arith.constant 1.000000e+00 : f32
    %81 = arith.maximumf %76, %cst_18 : f32
    %82 = arith.divf %80, %81 : f32
    %cst_19 = arith.constant 0.000000e+00 : f32
    %83 = arith.select %79, %82, %cst_19 : f32
    %84 = vector.broadcast %49 : i32 to vector<16x16xi32>
    %85 = arith.cmpi slt, %14, %84 : vector<16x16xi32>
    %86 = vector.broadcast %53 : i32 to vector<16x16xi32>
    %87 = arith.cmpi slt, %15, %86 : vector<16x16xi32>
    %88 = arith.andi %85, %87 : vector<16x16xi1>
    %89 = arith.extui %88 : vector<16x16xi1> to vector<16x16xi32>
    %90 = arith.sitofp %89 : vector<16x16xi32> to vector<16x16xf32>
    %91 = vector.broadcast %83 : f32 to vector<16x16xf32>
    %92 = arith.mulf %90, %91 : vector<16x16xf32>
    %cst_20 = arith.constant 0.000000e+00 : f32
    %93 = vector.broadcast %cst_20 : f32 to vector<16x16xf32>
    %94 = vector.extract_strided_slice %1 {offsets = [0, 0, 0], sizes = [1, 16, 16], strides = [1, 1, 1]} : vector<4x16x16xf32> to vector<1x16x16xf32>
    %95 = vector.shape_cast %94 : vector<1x16x16xf32> to vector<16x16xf32>
    %cst_21 = arith.constant dense<0.000000e+00> : vector<16x16xf32>
    %96 = tpu.matmul %58, %95, %cst_21 {dimension_numbers = #tpu.dot_dimension_numbers<[1], [0], [0], [1], [0, 0, 1, 1], [], []>} : vector<16x16xf32>, vector<16x16xf32>, vector<16x16xf32> -> vector<16x16xf32>
    %cst_22 = arith.constant dense<0.000000e+00> : vector<16x16xf32>
    %97 = tpu.matmul %96, %68, %cst_22 {dimension_numbers = #tpu.dot_dimension_numbers<[1], [0], [0], [1], [0, 0, 1, 1], [], []>} : vector<16x16xf32>, vector<16x16xf32>, vector<16x16xf32> -> vector<16x16xf32>
    %98 = vector.extract_strided_slice %3 {offsets = [0, 0, 0], sizes = [1, 16, 16], strides = [1, 1, 1]} : vector<4x16x16xf32> to vector<1x16x16xf32>
    %99 = vector.shape_cast %98 : vector<1x16x16xf32> to vector<16x16xf32>
    %cst_23 = arith.constant dense<0.000000e+00> : vector<16x16xf32>
    %100 = tpu.matmul %63, %99, %cst_23 {dimension_numbers = #tpu.dot_dimension_numbers<[1], [0], [0], [1], [0, 0, 1, 1], [], []>} : vector<16x16xf32>, vector<16x16xf32>, vector<16x16xf32> -> vector<16x16xf32>
    %cst_24 = arith.constant dense<0.000000e+00> : vector<16x16xf32>
    %101 = tpu.matmul %100, %73, %cst_24 {dimension_numbers = #tpu.dot_dimension_numbers<[1], [0], [0], [1], [0, 0, 1, 1], [], []>} : vector<16x16xf32>, vector<16x16xf32>, vector<16x16xf32> -> vector<16x16xf32>
    %102 = arith.subf %97, %101 : vector<16x16xf32>
    %103 = math.absf %102 : vector<16x16xf32>
    %104 = arith.addf %93, %103 : vector<16x16xf32>
    %105 = vector.extract_strided_slice %1 {offsets = [1, 0, 0], sizes = [1, 16, 16], strides = [1, 1, 1]} : vector<4x16x16xf32> to vector<1x16x16xf32>
    %106 = vector.shape_cast %105 : vector<1x16x16xf32> to vector<16x16xf32>
    %cst_25 = arith.constant dense<0.000000e+00> : vector<16x16xf32>
    %107 = tpu.matmul %58, %106, %cst_25 {dimension_numbers = #tpu.dot_dimension_numbers<[1], [0], [0], [1], [0, 0, 1, 1], [], []>} : vector<16x16xf32>, vector<16x16xf32>, vector<16x16xf32> -> vector<16x16xf32>
    %cst_26 = arith.constant dense<0.000000e+00> : vector<16x16xf32>
    %108 = tpu.matmul %107, %68, %cst_26 {dimension_numbers = #tpu.dot_dimension_numbers<[1], [0], [0], [1], [0, 0, 1, 1], [], []>} : vector<16x16xf32>, vector<16x16xf32>, vector<16x16xf32> -> vector<16x16xf32>
    %109 = vector.extract_strided_slice %3 {offsets = [1, 0, 0], sizes = [1, 16, 16], strides = [1, 1, 1]} : vector<4x16x16xf32> to vector<1x16x16xf32>
    %110 = vector.shape_cast %109 : vector<1x16x16xf32> to vector<16x16xf32>
    %cst_27 = arith.constant dense<0.000000e+00> : vector<16x16xf32>
    %111 = tpu.matmul %63, %110, %cst_27 {dimension_numbers = #tpu.dot_dimension_numbers<[1], [0], [0], [1], [0, 0, 1, 1], [], []>} : vector<16x16xf32>, vector<16x16xf32>, vector<16x16xf32> -> vector<16x16xf32>
    %cst_28 = arith.constant dense<0.000000e+00> : vector<16x16xf32>
    %112 = tpu.matmul %111, %73, %cst_28 {dimension_numbers = #tpu.dot_dimension_numbers<[1], [0], [0], [1], [0, 0, 1, 1], [], []>} : vector<16x16xf32>, vector<16x16xf32>, vector<16x16xf32> -> vector<16x16xf32>
    %113 = arith.subf %108, %112 : vector<16x16xf32>
    %114 = math.absf %113 : vector<16x16xf32>
    %115 = arith.addf %104, %114 : vector<16x16xf32>
    %116 = vector.extract_strided_slice %1 {offsets = [2, 0, 0], sizes = [1, 16, 16], strides = [1, 1, 1]} : vector<4x16x16xf32> to vector<1x16x16xf32>
    %117 = vector.shape_cast %116 : vector<1x16x16xf32> to vector<16x16xf32>
    %cst_29 = arith.constant dense<0.000000e+00> : vector<16x16xf32>
    %118 = tpu.matmul %58, %117, %cst_29 {dimension_numbers = #tpu.dot_dimension_numbers<[1], [0], [0], [1], [0, 0, 1, 1], [], []>} : vector<16x16xf32>, vector<16x16xf32>, vector<16x16xf32> -> vector<16x16xf32>
    %cst_30 = arith.constant dense<0.000000e+00> : vector<16x16xf32>
    %119 = tpu.matmul %118, %68, %cst_30 {dimension_numbers = #tpu.dot_dimension_numbers<[1], [0], [0], [1], [0, 0, 1, 1], [], []>} : vector<16x16xf32>, vector<16x16xf32>, vector<16x16xf32> -> vector<16x16xf32>
    %120 = vector.extract_strided_slice %3 {offsets = [2, 0, 0], sizes = [1, 16, 16], strides = [1, 1, 1]} : vector<4x16x16xf32> to vector<1x16x16xf32>
    %121 = vector.shape_cast %120 : vector<1x16x16xf32> to vector<16x16xf32>
    %cst_31 = arith.constant dense<0.000000e+00> : vector<16x16xf32>
    %122 = tpu.matmul %63, %121, %cst_31 {dimension_numbers = #tpu.dot_dimension_numbers<[1], [0], [0], [1], [0, 0, 1, 1], [], []>} : vector<16x16xf32>, vector<16x16xf32>, vector<16x16xf32> -> vector<16x16xf32>
    %cst_32 = arith.constant dense<0.000000e+00> : vector<16x16xf32>
    %123 = tpu.matmul %122, %73, %cst_32 {dimension_numbers = #tpu.dot_dimension_numbers<[1], [0], [0], [1], [0, 0, 1, 1], [], []>} : vector<16x16xf32>, vector<16x16xf32>, vector<16x16xf32> -> vector<16x16xf32>
    %124 = arith.subf %119, %123 : vector<16x16xf32>
    %125 = math.absf %124 : vector<16x16xf32>
    %126 = arith.addf %115, %125 : vector<16x16xf32>
    %127 = vector.extract_strided_slice %1 {offsets = [3, 0, 0], sizes = [1, 16, 16], strides = [1, 1, 1]} : vector<4x16x16xf32> to vector<1x16x16xf32>
    %128 = vector.shape_cast %127 : vector<1x16x16xf32> to vector<16x16xf32>
    %cst_33 = arith.constant dense<0.000000e+00> : vector<16x16xf32>
    %129 = tpu.matmul %58, %128, %cst_33 {dimension_numbers = #tpu.dot_dimension_numbers<[1], [0], [0], [1], [0, 0, 1, 1], [], []>} : vector<16x16xf32>, vector<16x16xf32>, vector<16x16xf32> -> vector<16x16xf32>
    %cst_34 = arith.constant dense<0.000000e+00> : vector<16x16xf32>
    %130 = tpu.matmul %129, %68, %cst_34 {dimension_numbers = #tpu.dot_dimension_numbers<[1], [0], [0], [1], [0, 0, 1, 1], [], []>} : vector<16x16xf32>, vector<16x16xf32>, vector<16x16xf32> -> vector<16x16xf32>
    %131 = vector.extract_strided_slice %3 {offsets = [3, 0, 0], sizes = [1, 16, 16], strides = [1, 1, 1]} : vector<4x16x16xf32> to vector<1x16x16xf32>
    %132 = vector.shape_cast %131 : vector<1x16x16xf32> to vector<16x16xf32>
    %cst_35 = arith.constant dense<0.000000e+00> : vector<16x16xf32>
    %133 = tpu.matmul %63, %132, %cst_35 {dimension_numbers = #tpu.dot_dimension_numbers<[1], [0], [0], [1], [0, 0, 1, 1], [], []>} : vector<16x16xf32>, vector<16x16xf32>, vector<16x16xf32> -> vector<16x16xf32>
    %cst_36 = arith.constant dense<0.000000e+00> : vector<16x16xf32>
    %134 = tpu.matmul %133, %73, %cst_36 {dimension_numbers = #tpu.dot_dimension_numbers<[1], [0], [0], [1], [0, 0, 1, 1], [], []>} : vector<16x16xf32>, vector<16x16xf32>, vector<16x16xf32> -> vector<16x16xf32>
    %135 = arith.subf %130, %134 : vector<16x16xf32>
    %136 = math.absf %135 : vector<16x16xf32>
    %137 = arith.addf %126, %136 : vector<16x16xf32>
    %138 = arith.mulf %137, %92 : vector<16x16xf32>
    %139 = arith.addf %19, %138 : vector<16x16xf32>
    %c8_i32_37 = arith.constant 8 : i32
    %140 = arith.muli %arg0, %c8_i32_37 : i32
    %c4_i32 = arith.constant 4 : i32
    %141 = arith.addi %140, %c4_i32 : i32
    %c0_i32_38 = arith.constant 0 : i32
    %142 = arith.addi %141, %c0_i32_38 : i32
    %143 = arith.index_cast %142 : i32 to index
    %144 = memref.load %arg1[%143] : memref<16xi32, #tpu.memory_space<smem>>
    %c1_i32_39 = arith.constant 1 : i32
    %145 = arith.addi %141, %c1_i32_39 : i32
    %146 = arith.index_cast %145 : i32 to index
    %147 = memref.load %arg1[%146] : memref<16xi32, #tpu.memory_space<smem>>
    %c2_i32_40 = arith.constant 2 : i32
    %148 = arith.addi %141, %c2_i32_40 : i32
    %149 = arith.index_cast %148 : i32 to index
    %150 = memref.load %arg1[%149] : memref<16xi32, #tpu.memory_space<smem>>
    %c3_i32_41 = arith.constant 3 : i32
    %151 = arith.addi %141, %c3_i32_41 : i32
    %152 = arith.index_cast %151 : i32 to index
    %153 = memref.load %arg1[%152] : memref<16xi32, #tpu.memory_space<smem>>
    %c0_i32_42 = arith.constant 0 : i32
    %154 = arith.addi %141, %c0_i32_42 : i32
    %155 = arith.index_cast %154 : i32 to index
    %156 = memref.load %arg2[%155] : memref<16xi32, #tpu.memory_space<smem>>
    %c1_i32_43 = arith.constant 1 : i32
    %157 = arith.addi %141, %c1_i32_43 : i32
    %158 = arith.index_cast %157 : i32 to index
    %159 = memref.load %arg2[%158] : memref<16xi32, #tpu.memory_space<smem>>
    %c2_i32_44 = arith.constant 2 : i32
    %160 = arith.addi %141, %c2_i32_44 : i32
    %161 = arith.index_cast %160 : i32 to index
    %162 = memref.load %arg2[%161] : memref<16xi32, #tpu.memory_space<smem>>
    %c3_i32_45 = arith.constant 3 : i32
    %163 = arith.addi %141, %c3_i32_45 : i32
    %164 = arith.index_cast %163 : i32 to index
    %165 = memref.load %arg2[%164] : memref<16xi32, #tpu.memory_space<smem>>
    %166 = arith.subi %153, %147 : i32
    %167 = arith.subi %165, %159 : i32
    %168 = arith.minsi %166, %167 : i32
    %c16_i32_46 = arith.constant 16 : i32
    %169 = arith.minsi %168, %c16_i32_46 : i32
    %170 = arith.subi %150, %144 : i32
    %171 = arith.subi %162, %156 : i32
    %172 = arith.minsi %170, %171 : i32
    %c16_i32_47 = arith.constant 16 : i32
    %173 = arith.minsi %172, %c16_i32_47 : i32
    %174 = vector.broadcast %147 : i32 to vector<16x16xi32>
    %175 = arith.addi %174, %10 : vector<16x16xi32>
    %176 = arith.cmpi eq, %11, %175 : vector<16x16xi32>
    %177 = arith.extui %176 : vector<16x16xi1> to vector<16x16xi32>
    %178 = arith.sitofp %177 : vector<16x16xi32> to vector<16x16xf32>
    %179 = vector.broadcast %159 : i32 to vector<16x16xi32>
    %180 = arith.addi %179, %10 : vector<16x16xi32>
    %181 = arith.cmpi eq, %11, %180 : vector<16x16xi32>
    %182 = arith.extui %181 : vector<16x16xi1> to vector<16x16xi32>
    %183 = arith.sitofp %182 : vector<16x16xi32> to vector<16x16xf32>
    %184 = vector.broadcast %144 : i32 to vector<16x16xi32>
    %185 = arith.addi %184, %13 : vector<16x16xi32>
    %186 = arith.cmpi eq, %12, %185 : vector<16x16xi32>
    %187 = arith.extui %186 : vector<16x16xi1> to vector<16x16xi32>
    %188 = arith.sitofp %187 : vector<16x16xi32> to vector<16x16xf32>
    %189 = vector.broadcast %156 : i32 to vector<16x16xi32>
    %190 = arith.addi %189, %13 : vector<16x16xi32>
    %191 = arith.cmpi eq, %12, %190 : vector<16x16xi32>
    %192 = arith.extui %191 : vector<16x16xi1> to vector<16x16xi32>
    %193 = arith.sitofp %192 : vector<16x16xi32> to vector<16x16xf32>
    %194 = arith.muli %169, %173 : i32
    %195 = arith.sitofp %194 : i32 to f32
    %cst_48 = arith.constant 4.000000e+00 : f32
    %196 = arith.mulf %195, %cst_48 : f32
    %c0_i32_49 = arith.constant 0 : i32
    %197 = arith.cmpi sgt, %169, %c0_i32_49 : i32
    %c0_i32_50 = arith.constant 0 : i32
    %198 = arith.cmpi sgt, %173, %c0_i32_50 : i32
    %199 = arith.andi %197, %198 : i1
    %cst_51 = arith.constant 5.000000e+00 : f32
    %200 = arith.mulf %cst_51, %18 : f32
    %cst_52 = arith.constant 1.000000e+00 : f32
    %201 = arith.maximumf %196, %cst_52 : f32
    %202 = arith.divf %200, %201 : f32
    %cst_53 = arith.constant 0.000000e+00 : f32
    %203 = arith.select %199, %202, %cst_53 : f32
    %204 = vector.broadcast %169 : i32 to vector<16x16xi32>
    %205 = arith.cmpi slt, %14, %204 : vector<16x16xi32>
    %206 = vector.broadcast %173 : i32 to vector<16x16xi32>
    %207 = arith.cmpi slt, %15, %206 : vector<16x16xi32>
    %208 = arith.andi %205, %207 : vector<16x16xi1>
    %209 = arith.extui %208 : vector<16x16xi1> to vector<16x16xi32>
    %210 = arith.sitofp %209 : vector<16x16xi32> to vector<16x16xf32>
    %211 = vector.broadcast %203 : f32 to vector<16x16xf32>
    %212 = arith.mulf %210, %211 : vector<16x16xf32>
    %cst_54 = arith.constant 0.000000e+00 : f32
    %213 = vector.broadcast %cst_54 : f32 to vector<16x16xf32>
    %214 = vector.extract_strided_slice %1 {offsets = [0, 0, 0], sizes = [1, 16, 16], strides = [1, 1, 1]} : vector<4x16x16xf32> to vector<1x16x16xf32>
    %215 = vector.shape_cast %214 : vector<1x16x16xf32> to vector<16x16xf32>
    %cst_55 = arith.constant dense<0.000000e+00> : vector<16x16xf32>
    %216 = tpu.matmul %178, %215, %cst_55 {dimension_numbers = #tpu.dot_dimension_numbers<[1], [0], [0], [1], [0, 0, 1, 1], [], []>} : vector<16x16xf32>, vector<16x16xf32>, vector<16x16xf32> -> vector<16x16xf32>
    %cst_56 = arith.constant dense<0.000000e+00> : vector<16x16xf32>
    %217 = tpu.matmul %216, %188, %cst_56 {dimension_numbers = #tpu.dot_dimension_numbers<[1], [0], [0], [1], [0, 0, 1, 1], [], []>} : vector<16x16xf32>, vector<16x16xf32>, vector<16x16xf32> -> vector<16x16xf32>
    %218 = vector.extract_strided_slice %3 {offsets = [0, 0, 0], sizes = [1, 16, 16], strides = [1, 1, 1]} : vector<4x16x16xf32> to vector<1x16x16xf32>
    %219 = vector.shape_cast %218 : vector<1x16x16xf32> to vector<16x16xf32>
    %cst_57 = arith.constant dense<0.000000e+00> : vector<16x16xf32>
    %220 = tpu.matmul %183, %219, %cst_57 {dimension_numbers = #tpu.dot_dimension_numbers<[1], [0], [0], [1], [0, 0, 1, 1], [], []>} : vector<16x16xf32>, vector<16x16xf32>, vector<16x16xf32> -> vector<16x16xf32>
    %cst_58 = arith.constant dense<0.000000e+00> : vector<16x16xf32>
    %221 = tpu.matmul %220, %193, %cst_58 {dimension_numbers = #tpu.dot_dimension_numbers<[1], [0], [0], [1], [0, 0, 1, 1], [], []>} : vector<16x16xf32>, vector<16x16xf32>, vector<16x16xf32> -> vector<16x16xf32>
    %222 = arith.subf %217, %221 : vector<16x16xf32>
    %223 = math.absf %222 : vector<16x16xf32>
    %224 = arith.addf %213, %223 : vector<16x16xf32>
    %225 = vector.extract_strided_slice %1 {offsets = [1, 0, 0], sizes = [1, 16, 16], strides = [1, 1, 1]} : vector<4x16x16xf32> to vector<1x16x16xf32>
    %226 = vector.shape_cast %225 : vector<1x16x16xf32> to vector<16x16xf32>
    %cst_59 = arith.constant dense<0.000000e+00> : vector<16x16xf32>
    %227 = tpu.matmul %178, %226, %cst_59 {dimension_numbers = #tpu.dot_dimension_numbers<[1], [0], [0], [1], [0, 0, 1, 1], [], []>} : vector<16x16xf32>, vector<16x16xf32>, vector<16x16xf32> -> vector<16x16xf32>
    %cst_60 = arith.constant dense<0.000000e+00> : vector<16x16xf32>
    %228 = tpu.matmul %227, %188, %cst_60 {dimension_numbers = #tpu.dot_dimension_numbers<[1], [0], [0], [1], [0, 0, 1, 1], [], []>} : vector<16x16xf32>, vector<16x16xf32>, vector<16x16xf32> -> vector<16x16xf32>
    %229 = vector.extract_strided_slice %3 {offsets = [1, 0, 0], sizes = [1, 16, 16], strides = [1, 1, 1]} : vector<4x16x16xf32> to vector<1x16x16xf32>
    %230 = vector.shape_cast %229 : vector<1x16x16xf32> to vector<16x16xf32>
    %cst_61 = arith.constant dense<0.000000e+00> : vector<16x16xf32>
    %231 = tpu.matmul %183, %230, %cst_61 {dimension_numbers = #tpu.dot_dimension_numbers<[1], [0], [0], [1], [0, 0, 1, 1], [], []>} : vector<16x16xf32>, vector<16x16xf32>, vector<16x16xf32> -> vector<16x16xf32>
    %cst_62 = arith.constant dense<0.000000e+00> : vector<16x16xf32>
    %232 = tpu.matmul %231, %193, %cst_62 {dimension_numbers = #tpu.dot_dimension_numbers<[1], [0], [0], [1], [0, 0, 1, 1], [], []>} : vector<16x16xf32>, vector<16x16xf32>, vector<16x16xf32> -> vector<16x16xf32>
    %233 = arith.subf %228, %232 : vector<16x16xf32>
    %234 = math.absf %233 : vector<16x16xf32>
    %235 = arith.addf %224, %234 : vector<16x16xf32>
    %236 = vector.extract_strided_slice %1 {offsets = [2, 0, 0], sizes = [1, 16, 16], strides = [1, 1, 1]} : vector<4x16x16xf32> to vector<1x16x16xf32>
    %237 = vector.shape_cast %236 : vector<1x16x16xf32> to vector<16x16xf32>
    %cst_63 = arith.constant dense<0.000000e+00> : vector<16x16xf32>
    %238 = tpu.matmul %178, %237, %cst_63 {dimension_numbers = #tpu.dot_dimension_numbers<[1], [0], [0], [1], [0, 0, 1, 1], [], []>} : vector<16x16xf32>, vector<16x16xf32>, vector<16x16xf32> -> vector<16x16xf32>
    %cst_64 = arith.constant dense<0.000000e+00> : vector<16x16xf32>
    %239 = tpu.matmul %238, %188, %cst_64 {dimension_numbers = #tpu.dot_dimension_numbers<[1], [0], [0], [1], [0, 0, 1, 1], [], []>} : vector<16x16xf32>, vector<16x16xf32>, vector<16x16xf32> -> vector<16x16xf32>
    %240 = vector.extract_strided_slice %3 {offsets = [2, 0, 0], sizes = [1, 16, 16], strides = [1, 1, 1]} : vector<4x16x16xf32> to vector<1x16x16xf32>
    %241 = vector.shape_cast %240 : vector<1x16x16xf32> to vector<16x16xf32>
    %cst_65 = arith.constant dense<0.000000e+00> : vector<16x16xf32>
    %242 = tpu.matmul %183, %241, %cst_65 {dimension_numbers = #tpu.dot_dimension_numbers<[1], [0], [0], [1], [0, 0, 1, 1], [], []>} : vector<16x16xf32>, vector<16x16xf32>, vector<16x16xf32> -> vector<16x16xf32>
    %cst_66 = arith.constant dense<0.000000e+00> : vector<16x16xf32>
    %243 = tpu.matmul %242, %193, %cst_66 {dimension_numbers = #tpu.dot_dimension_numbers<[1], [0], [0], [1], [0, 0, 1, 1], [], []>} : vector<16x16xf32>, vector<16x16xf32>, vector<16x16xf32> -> vector<16x16xf32>
    %244 = arith.subf %239, %243 : vector<16x16xf32>
    %245 = math.absf %244 : vector<16x16xf32>
    %246 = arith.addf %235, %245 : vector<16x16xf32>
    %247 = vector.extract_strided_slice %1 {offsets = [3, 0, 0], sizes = [1, 16, 16], strides = [1, 1, 1]} : vector<4x16x16xf32> to vector<1x16x16xf32>
    %248 = vector.shape_cast %247 : vector<1x16x16xf32> to vector<16x16xf32>
    %cst_67 = arith.constant dense<0.000000e+00> : vector<16x16xf32>
    %249 = tpu.matmul %178, %248, %cst_67 {dimension_numbers = #tpu.dot_dimension_numbers<[1], [0], [0], [1], [0, 0, 1, 1], [], []>} : vector<16x16xf32>, vector<16x16xf32>, vector<16x16xf32> -> vector<16x16xf32>
    %cst_68 = arith.constant dense<0.000000e+00> : vector<16x16xf32>
    %250 = tpu.matmul %249, %188, %cst_68 {dimension_numbers = #tpu.dot_dimension_numbers<[1], [0], [0], [1], [0, 0, 1, 1], [], []>} : vector<16x16xf32>, vector<16x16xf32>, vector<16x16xf32> -> vector<16x16xf32>
    %251 = vector.extract_strided_slice %3 {offsets = [3, 0, 0], sizes = [1, 16, 16], strides = [1, 1, 1]} : vector<4x16x16xf32> to vector<1x16x16xf32>
    %252 = vector.shape_cast %251 : vector<1x16x16xf32> to vector<16x16xf32>
    %cst_69 = arith.constant dense<0.000000e+00> : vector<16x16xf32>
    %253 = tpu.matmul %183, %252, %cst_69 {dimension_numbers = #tpu.dot_dimension_numbers<[1], [0], [0], [1], [0, 0, 1, 1], [], []>} : vector<16x16xf32>, vector<16x16xf32>, vector<16x16xf32> -> vector<16x16xf32>
    %cst_70 = arith.constant dense<0.000000e+00> : vector<16x16xf32>
    %254 = tpu.matmul %253, %193, %cst_70 {dimension_numbers = #tpu.dot_dimension_numbers<[1], [0], [0], [1], [0, 0, 1, 1], [], []>} : vector<16x16xf32>, vector<16x16xf32>, vector<16x16xf32> -> vector<16x16xf32>
    %255 = arith.subf %250, %254 : vector<16x16xf32>
    %256 = math.absf %255 : vector<16x16xf32>
    %257 = arith.addf %246, %256 : vector<16x16xf32>
    %258 = arith.mulf %257, %212 : vector<16x16xf32>
    %259 = arith.addf %139, %258 : vector<16x16xf32>
    %cst_71 = arith.constant 4.8828125E-4 : f32
    %260 = arith.mulf %9, %cst_71 : f32
    %261 = vector.shape_cast %259 : vector<16x16xf32> to vector<1x16x16xf32>
    %cst_72 = arith.constant dense<0.000000e+00> : vector<1xf32>
    %262 = vector.multi_reduction <add>, %261, %cst_72 [1, 2] : vector<1x16x16xf32> to vector<1xf32>
    %263 = vector.shape_cast %262 : vector<1xf32> to vector<1x1x1xf32>
    %264 = vector.extract %263[0, 0, 0] : f32 from vector<1x1x1xf32>
    %265 = arith.addf %260, %264 : f32
    %266 = vector.broadcast %265 : f32 to vector<1x8x128xf32>
    %c0_73 = arith.constant 0 : index
    %c0_74 = arith.constant 0 : index
    %c0_75 = arith.constant 0 : index
    %267 = vector.load %arg6[%c0_73, %c0_74, %c0_75] : memref<1x8x128xf32, #tpu.memory_space<vmem>>, vector<1x8x128xf32>
    tpu.vector_store %arg6[%c0_73, %c0_74, %c0_75], %266 {strides = array<i32>} : memref<1x8x128xf32, #tpu.memory_space<vmem>>, vector<1x8x128xf32>,
    return
  }
  func.func @transform_0(%arg0: i32, %arg1: memref<16xi32, #tpu.memory_space<smem>>, %arg2: memref<16xi32, #tpu.memory_space<smem>>, %arg3: memref<2xi32, #tpu.memory_space<smem>>) -> (i32, i32, i32, i32) {
    %c0_i32 = arith.constant 0 : i32
    %c0_i32_0 = arith.constant 0 : i32
    %c0_i32_1 = arith.constant 0 : i32
    %c0_i32_2 = arith.constant 0 : i32
    return %arg0, %c0_i32, %c0_i32_0, %c0_i32_1 : i32, i32, i32, i32
  }
  func.func @transform_1(%arg0: i32, %arg1: memref<16xi32, #tpu.memory_space<smem>>, %arg2: memref<16xi32, #tpu.memory_space<smem>>, %arg3: memref<2xi32, #tpu.memory_space<smem>>) -> (i32, i32, i32, i32) {
    %c0_i32 = arith.constant 0 : i32
    %c0_i32_0 = arith.constant 0 : i32
    %c0_i32_1 = arith.constant 0 : i32
    %c0_i32_2 = arith.constant 0 : i32
    return %arg0, %c0_i32, %c0_i32_0, %c0_i32_1 : i32, i32, i32, i32
  }
  func.func @transform_2(%arg0: i32, %arg1: memref<16xi32, #tpu.memory_space<smem>>, %arg2: memref<16xi32, #tpu.memory_space<smem>>, %arg3: memref<2xi32, #tpu.memory_space<smem>>) -> (i32, i32, i32) {
    %c0_i32 = arith.constant 0 : i32
    %c0_i32_0 = arith.constant 0 : i32
    %c0_i32_1 = arith.constant 0 : i32
    return %arg0, %c0_i32, %c0_i32_0 : i32, i32, i32
  }
}

</mosaic_0001>

<bundles_post_ra>
// kernel: mediapipe_eye_enhancement_loss.1
= control target key start
LH: loop header
LB: loop body
LE: loop exit
PB: predicated region body
PF: predicated region fallthrough
CT: control target
= control target key end

     0   :  { %s4779_s0 = inlined_call_operand.vmem [shape: s32[16], index: 0, kind: input, shape index: {}]   ;;  %s4780_s3 = inlined_call_operand.hbm [shape: f32[2,4,16,16], index: 3, kind: input, shape index: {}]   ;;  %s4781_s4 = inlined_call_operand.hbm [shape: f32[2,4,16,16], index: 4, kind: input, shape index: {}]   ;;  %s4782_s5 = inlined_call_operand.vmem [shape: f32[2,8,128], index: 5, kind: output, shape index: {}]   ;;  %s4783_s1 = inlined_call_operand.vmem [shape: s32[16], index: 1, kind: input, shape index: {}]   ;;  %s4784_s2 = inlined_call_operand.vmem [shape: s32[2], index: 2, kind: input, shape index: {}]  }
   0x1   :  { %s10_s20 = sshll.u32 %s4779_s0, 4  ;;  %s14_s23 = sshll.u32 %s4783_s1, 4  ;;  %s11_s20 = int_to_ptr.vmem [resolvable:$true] %s10_s20  ;;  %s15_s23 = int_to_ptr.vmem [resolvable:$true] %s14_s23 }
   0x2   :  { %s3706_s24 = scalar_lea.vmem %s11_s20, 16  ;;  %p3711_p1 = scmp.lt.s32.totalorder %s11_s20, %s11_s20 }
   0x3   :  { %p3707_p0 = scmp.ne.s32.totalorder %s11_s20, %s3706_s24  ;;  %p3712_p2 = scmp.lt.s32.totalorder %s3706_s24, %s3706_s24 }
   0x5   :  { %p3713_p3 = por %p3712_p2, %p3711_p1 }
   0x7   :  { %p3714_p4 = pnand %p3713_p3, %p3707_p0 }
   0x9   :  { %3717 = shalt.err (!%p3714_p4)  }
   0xa   :  { %s3840_s25 = smov [#allocation3]   ;;  %s3718_s26 = scalar_lea.vmem %s15_s23, 16 }
   0xb   :  { %13 = dma.vmem_to_smem %s11_s20, 16, %s3840_s25, [#allocation2] }
   0xc   :  { %p3719_p5 = scmp.ne.s32.totalorder %s15_s23, %s3718_s26  ;;  %p3723_p6 = scmp.lt.s32.totalorder %s15_s23, %s15_s23 }
   0xd   :  { %p3724_p7 = scmp.lt.s32.totalorder %s3718_s26, %s3718_s26 }
   0xf   :  { %p3725_p8 = por %p3724_p7, %p3723_p6 }
  0x11   :  { %p3726_p9 = pnand %p3725_p8, %p3719_p5 }
  0x13   :  { %3729 = shalt.err (!%p3726_p9)  }
  0x14   :  { %s3841_s0 = smov [#allocation4]   ;;  %s18_s28 = sshll.u32 %s4784_s2, 4  ;;  %s19_s28 = int_to_ptr.vmem [resolvable:$true] %s18_s28 }
  0x15   :  { %17 = dma.vmem_to_smem %s15_s23, 16, %s3841_s0, [#allocation2] }
  0x16   :  { %s3730_s29 = scalar_lea.vmem %s19_s28, 16  ;;  %p3735_p11 = scmp.lt.s32.totalorder %s19_s28, %s19_s28 }
  0x17   :  { %p3731_p10 = scmp.ne.s32.totalorder %s19_s28, %s3730_s29  ;;  %p3736_p12 = scmp.lt.s32.totalorder %s3730_s29, %s3730_s29 }
  0x19   :  { %p3737_p13 = por %p3736_p12, %p3735_p11 }
  0x1b   :  { %p3738_p0 = pnand %p3737_p13, %p3731_p10 }
  0x1d   :  { %3741 = shalt.err (!%p3738_p0)  }
  0x1e   :  { %s3842_s30 = smov [#allocation5]  }
  0x1f   :  { %21 = dma.vmem_to_smem %s19_s28, 16, %s3842_s30, [#allocation2] }
  0x20   :  { %3814 = dma.done.wait [#allocation2], 48 }
  0x21   :  { %3815 = vsyncadd [#allocation2], 4294967248 }
  0x22   :  { %23 = sfence }
  0x23   :  { %24 = vsyncpa [#allocation7], 0 }
  0x24   :  { %26 = vsyncpa [#allocation7 + $0x1], 0 }
  0x25   :  { %27 = vsyncpa [#allocation9], 0 }
  0x26   :  { %29 = vsyncpa [#allocation9 + $0x1], 0  ;;  %s3889_s6 = smov 0   ;;  %s3891_s2 = smov 0  }
  0x27   :  { %s3893_s7 = smov 0   ;;  %s3895_s8 = smov 0  }
  0x28 LB: > { %s3908_s9 = sadd.s32 4294967295, %s3838_s8   ;;  %s3911_s10 = sadd.s32 1, %s3838_s8   ;;  %s3838_s8 = sphi %s3895_s8, %s4824_s8   ;;  %s3834_s7 = sphi %s3893_s7, %s4823_s7   ;;  %s3830_s2 = sphi %s3891_s2, %s4822_s2   ;;  %s3826_s6 = sphi %s3889_s6, %s4821_s6  }
  0x29   : > { %s39_s11 = ssub.s32 %s3838_s8, %s3911_s10  ;;  %s42_s12 = sadd.s32 1, %s3834_s7 }
  0x2a   : > { %p40_p1 = scmp.eq.s32.totalorder %s39_s11, 0  ;;  %p49_p2 = scmp.ne.s32.totalorder %s3834_s7, %s3830_s2 }
  0x2b   : > { %p50_p3 = scmp.eq.s32.totalorder %s3838_s8, 0  ;;  %p55_p4 = scmp.ne.s32.totalorder %s3830_s2, %s3826_s6 }
  0x2c   : > { %s3921_s13 = scalar_select %p40_p1, %s3834_s7, %s42_s12  }
  0x2d   : > { %p51_p5 = por %p50_p3, %p49_p2  ;;  %p56_p6 = scmp.eq.s32.totalorder %s3908_s9, 0 }
  0x2e   : > { %p3661_p7 = scmp.lt.s32.totalorder %s3838_s8, 2  ;;  %s3930_s15 = sand.u32 1, %s3834_s7  }
  0x2f   : > { %p3925_p8 = por %p56_p6, %p55_p4  ;;  %s3137_s16 = sshll.u32 %s3930_s15, 6 }
  0x30   : > { %s3284_s17 = sshll.u32 %s3838_s8, 10  ;;  %s135_s21 = scalar_lea.vmem [#allocation6], %s3137_s16 }
  0x31   : > { %s4786_s14 = scalar_select %p3925_p8, 1, 0 }
  0x32   : > { %s3939_s20 = scalar_lea.hbm %s4780_s3, %s3284_s17  ;;  %s142_s22 = sshll.u32 %s135_s21, 4  ;;  %s3943_s22 = int_to_ptr.vmem [resolvable:$true] %s142_s22 }
  0x33   : > { %p3945_p9 = pnand %p3661_p7, %p51_p5  ;;  %s132_s24 = scalar_lea.sflag [#allocation7], %s3930_s15 }
  0x34   : > { %s3742_s25 = scalar_lea.hbm %s3939_s20, 1024  ;;  %s3747_s1 = scalar_lea.hbm %s4780_s3, 2048 }
  0x35   : > { %p3743_p11 = scmp.ne.s32.totalorder %s3939_s20, %s3742_s25  ;;  %p3744_p12 = pneg %p3945_p9 }
  0x36   : > { %p3748_p1 = scmp.lt.s32.totalorder %s3939_s20, %s4780_s3  ;;  %p3749_p2 = scmp.lt.s32.totalorder %s3747_s1, %s3742_s25 }
  0x37   : > { %p3745_p13 = pnand %p3744_p12, %p3743_p11 }
  0x38   : > { %p3750_p3 = por %p3749_p2, %p3748_p1 }
  0x39   : > { %p3746_p0 = pneg %p3745_p13 }
  0x3b   : > { %p3751_p4 = pnand %p3750_p3, %p3746_p0 }
  0x3d   : > { %3754 = shalt.err (!%p3751_p4)
}
  0x3e   : > { %s3755_s29 = scalar_lea.vmem %s3943_s22, 1024  ;;  %s3843_s30 = smov [#allocation6]  }
  0x3f   : > { %p3756_p5 = scmp.ne.s32.totalorder %s3943_s22, %s3755_s29  ;;  %s3760_s6 = sshll.u32 %s3843_s30, 4  ;;  %s3761_s6 = int_to_ptr.vmem [resolvable:$false] %s3760_s6 }
  0x40   : > { %s3762_s11 = scalar_lea.vmem %s3761_s6, 2048  ;;  %p3763_p11 = scmp.lt.s32.totalorder %s3943_s22, %s3761_s6 }
  0x41   : > { %p3758_p6 = pnand %p3756_p5, %p3744_p12  ;;  %p3764_p13 = scmp.lt.s32.totalorder %s3762_s11, %s3755_s29 }
  0x43   : > { %p3759_p7 = pneg %p3758_p6  ;;  %p3765_p10 = por %p3764_p13, %p3763_p11 }
  0x45   : > { %p3766_p1 = pnand %p3765_p10, %p3759_p7 }
  0x47   : > { %3769 = shalt.err (!%p3766_p1)
}
  0x48   : > { %s3844_s12 = smov 128   ;;  %s3845_s18 = smov 8  }
  0x49   : > { %3657 = dma.hbm_to_vmem [thread:$0]  (!%p3945_p9), %s3939_s20, 1024, %s3943_s22, %s132_s24, %s3844_s12, %s3844_s12, %s3845_s18  }
  0x4a   : > { %p171_p10 = scmp.lt.s32.totalorder %s3838_s8, 3  ;;  %s3986_s25 = scalar_lea.hbm %s4781_s4, %s3284_s17 }
  0x4b   : > { %p4788_p0 = scmp.ge.s32.totalorder %s3838_s8, 1  ;;  %s156_s0 = scalar_lea.vmem [#allocation8], %s3137_s16 }
  0x4c   : > { %s163_s1 = sshll.u32 %s156_s0, 4  ;;  %s153_s20 = scalar_lea.sflag [#allocation9], %s3930_s15  ;;  %s3996_s1 = int_to_ptr.vmem [resolvable:$true] %s163_s1 }
  0x4d   : > { %p3990_p2 = pnand %p4788_p0, %p171_p10  ;;  %s3770_s22 = scalar_lea.hbm %s3986_s25, 1024 }
  0x4e   : > { %p3771_p3 = scmp.ne.s32.totalorder %s3986_s25, %s3770_s22  ;;  %s3775_s24 = scalar_lea.hbm %s4781_s4, 2048 }
  0x4f   : > { %p3776_p6 = scmp.lt.s32.totalorder %s3986_s25, %s4781_s4  ;;  %p3777_p7 = scmp.lt.s32.totalorder %s3775_s24, %s3770_s22 }
  0x50   : > { %p3773_p4 = pnand %p3771_p3, %p3744_p12 }
  0x51   : > { %p3778_p11 = por %p3777_p7, %p3776_p6 }
  0x52   : > { %p3774_p5 = pneg %p3773_p4 }
  0x54   : > { %p3779_p13 = pnand %p3778_p11, %p3774_p5 }
  0x56   : > { %3782 = shalt.err (!%p3779_p13)
}
  0x57   : > { %s3783_s15 = scalar_lea.vmem %s3996_s1, 1024  ;;  %s3846_s16 = smov [#allocation8]  }
  0x58   : > { %p3784_p1 = scmp.ne.s32.totalorder %s3996_s1, %s3783_s15  ;;  %s3788_s29 = sshll.u32 %s3846_s16, 4  ;;  %s3789_s29 = int_to_ptr.vmem [resolvable:$false] %s3788_s29 }
  0x59   : > { %s3790_s30 = scalar_lea.vmem %s3789_s29, 2048  ;;  %p3791_p3 = scmp.lt.s32.totalorder %s3996_s1, %s3789_s29 }
  0x5a   : > { %p3786_p10 = pnand %p3784_p1, %p3744_p12  ;;  %p3792_p4 = scmp.lt.s32.totalorder %s3790_s30, %s3783_s15 }
  0x5c   : > { %p3787_p0 = pneg %p3786_p10  ;;  %p3793_p8 = por %p3792_p4, %p3791_p3 }
  0x5e   : > { %p3794_p6 = pnand %p3793_p8, %p3787_p0 }
  0x60   : > { %3797 = shalt.err (!%p3794_p6)
}
  0x61   : > { %3660 = dma.hbm_to_vmem [thread:$0]  (!%p3945_p9), %s3986_s25, 1024, %s3996_s1, %s153_s20, %s3844_s12, %s3844_s12, %s3845_s18  }
  0x62   : > { %175 = sbr.rel (%p3990_p2) target bundleno = 788 (0x314), region = 28  ;;  %s177_s6 = sand.u32 (!%p3990_p2), 1, %s3830_s2  }
  0x63   : > { %s3144_s11 = sshll.u32 (!%p3990_p2), %s177_s6, 6  ;;  %s178_s19 = scalar_lea.sflag (!%p3990_p2), [#allocation7], %s177_s6 }
  0x64   : > { %s4027_s21 = scalar_lea.vmem (!%p3990_p2), [#allocation6], %s3144_s11  ;;  %p4790_p8 = scmp.ne.s32.totalorder (!%p3990_p2), %s4786_s14, 0 }
  0x67   : > { %3817 = dma.done.wait (%p4790_p8), %s178_s19, 1024  }
  0x68   : > { %3819 = vsyncadd (%p4790_p8), %s178_s19, 4294966272  ;;  %s187_s23 = scalar_lea.sflag [#allocation9], %s177_s6  ;;  %s4033_s0 = scalar_lea.vmem [#allocation8], %s3144_s11 }
  0x69   : > { %3821 = dma.done.wait (%p4790_p8), %s187_s23, 1024  }
  0x6a   : > { %3823 = vsyncadd (%p4790_p8), %s187_s23, 4294966272  ;;  %v276_v0 = vlaneseq  ;;  %s4040_s12 = sshll.u32 %s3908_s9, 3  ;;  %v4056_v3 = vld [vmem:[%s4027_s21 + $0x8] sm:$0xff]  ;;  %v4059_v4 = vld [vmem:[%s4027_s21] sm:$0xff]  ;;  %vm251_vm0 = vcmask 130048   ;;  %v3847_v15 = vmov 0.0  }
  0x6b   : > { %s285_s18 = sadd.s32 1, %s4040_s12  ;;  %s289_s25 = sadd.s32 3, %s4040_s12  ;;  %v4064_v6 = vld [vmem:[%s4033_s0 + $0x8] sm:$0xff]  ;;  %3418 = vmatprep.subr.mxu0 %v4056_v3  ;;  %v4072_v9 = vld [vmem:[%s4033_s0] sm:$0xff]  ;;  %v4116_v20 = vld [vmem:[%s4027_s21 + $0x18] sm:$0xff]  ;;  %v3848_v28 = vmov 1.0  }
  0x6c   : > { %v4044_v1 = vshrl.u32 %v276_v0, 7  ;;  %s286_s26 = sld [smem:[#allocation3 + %s285_s18]]  ;;  %s1659_s14 = sadd.s32 5, %s4040_s12  ;;  %v4061_v5 = vand.u32 127, %v276_v0  ;;  %v236_v8 = vsub.f32 %v4056_v3, %v4064_v6  ;;  %3419 = vmatpush3.msra.mxu0 %v4056_v3  ;;  %v235_v12 = vsub.f32 %v4059_v4, %v4072_v9  ;;  %v4125_v22 = vld [vmem:[%s4027_s21 + $0x10] sm:$0xff]  ;;  %v4140_v25 = vld [vmem:[%s4033_s0 + $0x18] sm:$0xff] }
  0x6d   : > { %s290_s1 = sld [smem:[#allocation3 + %s289_s25]]  ;;  %s1663_s22 = sadd.s32 7, %s4040_s12  ;;  %3420 = vmatprep.subr.mxu0 %v4059_v4  ;;  %v4151_v27 = vld [vmem:[%s4033_s0 + $0x10] sm:$0xff]  ;;  %v4163_v29 = vld [vmem:[%s4027_s21 + $0x28] sm:$0xff]  ;;  %v4171_v30 = vld [vmem:[%s4027_s21 + $0x20] sm:$0xff]  ;;  %v238_v55 = vsub.f32 %v4116_v20, %v4140_v25 }
  0x6e   : > { %s4047_s20 = sld [smem:[#allocation4 + %s285_s18]]  ;;  %v4051_v2 = vadd.s32 8, %v4044_v1  ;;  %3421 = vmatpush3.msra.mxu0 %v4059_v4  ;;  %v4180_v31 = vld [vmem:[%s4033_s0 + $0x28] sm:$0xff]  ;;  %v4185_v32 = vld [vmem:[%s4033_s0 + $0x20] sm:$0xff]  ;;  %v4195_v34 = vld [vmem:[%s4027_s21 + $0x38] sm:$0xff]  ;;  %v237_v50 = vsub.f32 %v4125_v22, %v4151_v27  ;;  %s287_s19 = sadd.s32 2, %s4040_s12 }
  0x6f   : > { %s294_s8 = sld [smem:[#allocation4 + %s289_s25]]  ;;  %3432 = vmatprep.subr.mxu0 %v4064_v6  ;;  %v4200_v35 = vld [vmem:[%s4027_s21 + $0x30] sm:$0xff]  ;;  %v4211_v38 = vld [vmem:[%s4033_s0 + $0x38] sm:$0xff]  ;;  %v244_v52 = vand.u32 2147483647, %v236_v8  ;;  %v239_v59 = vsub.f32 %v4171_v30, %v4185_v32  ;;  %v240_v63 = vsub.f32 %v4163_v29, %v4180_v31 }
  0x70   : > { %s4053_s17 = sld [smem:[#allocation3 + %s1659_s14]]  ;;  %v4217_v40 = vld [vmem:[%s4033_s0 + $0x30] sm:$0xff]  ;;  %v243_v53 = vand.u32 2147483647, %v235_v12  ;;  %v245_v54 = vand.u32 2147483647, %v237_v50 }
  0x71   : > { %s4066_s24 = sld [smem:[#allocation3 + %s1663_s22]]  ;;  %v253_v57 = vsel %vm251_vm0, %v244_v52, 0.0  ;;  %v246_v60 = vand.u32 2147483647, %v238_v55  ;;  %v247_v0 = vand.u32 2147483647, %v239_v59 }
  0x72   : > { %v307_v7 = vstv %s286_s26  ;;  %s4074_s27 = sld [smem:[#allocation4 + %s1659_s14]]  ;;  %v252_v56 = vsel %vm251_vm0, %v243_v53, 0.0  ;;  %v255_v61 = vsel %vm251_vm0, %v245_v54, 0.0 }
  0x73   : > { %s295_s28 = ssub.s32 %s290_s1, %s286_s26  ;;  %v308_v10 = vadd.s32 %v307_v7, %v4044_v1  ;;  %v309_v11 = vadd.s32 %v307_v7, %v4051_v2  ;;  %s1668_s15 = sld [smem:[#allocation4 + %s1663_s22]]  ;;  %v254_v58 = vadd.f32 %v253_v57, %v252_v56  ;;  %v248_v7 = vand.u32 2147483647, %v240_v63 }
  0x74   : > { %v316_v13 = vstv %s4047_s20  ;;  %s4084_s16 = sld [smem:[#allocation3 + %s4040_s12]]  ;;  %v259_v8 = vsel %vm251_vm0, %v247_v0, 0.0  ;;  %s1657_s1 = sadd.s32 4, %s4040_s12 }
  0x75   : > { %vm310_vm1 = vcmp.eq.s32.totalorder %v4061_v5, %v308_v10  ;;  %vm311_vm2 = vcmp.eq.s32.totalorder %v4061_v5, %v309_v11  ;;  %s296_s29 = ssub.s32 %s294_s8, %s4047_s20  ;;  %v317_v14 = vadd.s32 %v316_v13, %v4044_v1  ;;  %v318_v18 = vadd.s32 %v316_v13, %v4051_v2  ;;  %s4286_s11 = sld [smem:[#allocation4 + %s4040_s12]] }
  0x76   : > { %v4092_v16 = vsel %vm310_vm1, 1.0, %v3847_v15  ;;  %v4096_v17 = vsel %vm311_vm2, 1.0, %v3847_v15  ;;  %p297_p9 = scmp.lt.s32.totalorder %s295_s28, %s296_s29  ;;  %v1681_v33 = vstv %s4053_s17  ;;  %v256_v62 = vadd.f32 %v255_v61, %v254_v58  ;;  %s288_s21 = sld [smem:[#allocation3 + %s287_s19]] }
  0x77   : > { %3422 = vmatprep.mubr.msk.f32.mxu0 %vm251_vm0, %v4092_v16  ;;  %vm319_vm3 = vcmp.eq.s32.totalorder %v4061_v5, %v317_v14  ;;  %s1669_s30 = ssub.s32 %s4066_s24, %s4053_s17  ;;  %vm320_vm4 = vcmp.eq.s32.totalorder %v4061_v5, %v318_v18  ;;  %v1682_v36 = vadd.s32 %v1681_v33, %v4044_v1  ;;  %v1683_v39 = vadd.s32 %v1681_v33, %v4051_v2  ;;  %s293_s23 = sld [smem:[#allocation4 + %s287_s19]] }
  0x78   : > { %3423 = vmatmul.mubr.msk.f32.vlgmr.msra.gmra.mxu0 %vm251_vm0, %v4096_v17  ;;  %s4826_s28 = smov (!%p297_p9, %s295_s28), %s296_s29  ;;  %v4109_v19 = vsel %vm319_vm3, 1.0, %v3847_v15  ;;  %v4119_v21 = vsel %vm320_vm4, 1.0, %v3847_v15  ;;  %v1690_v37 = vstv %s4074_s27  ;;  %v242_v10 = vsub.f32 %v4195_v34, %v4211_v38  ;;  %s4395_s20 = sld [smem:[#allocation3 + %s1657_s1]] }
  0x79   : > { %3433 = vmatpush3.msra.mxu0 %v4064_v6  ;;  %3436 = vmatprep.mubr.msk.f32.mxu0 %vm251_vm0, %v4109_v19  ;;  %s1670_s6 = ssub.s32 %s1668_s15, %s4074_s27  ;;  %vm1684_vm6 = vcmp.eq.s32.totalorder %v4061_v5, %v1682_v36  ;;  %v1691_v41 = vadd.s32 %v1690_v37, %v4044_v1  ;;  %vm1685_vm7 = vcmp.eq.s32.totalorder %v4061_v5, %v1683_v39  ;;  %v261_v12 = vsel %vm251_vm0, %v248_v7, 0.0  ;;  %p299_p5 = scmp.lt.s32.totalorder %s4826_s28, 16 }
  0x7a   : > { %3434 = vmatprep.subr.mxu0 %v4072_v9  ;;  %p1671_p12 = scmp.lt.s32.totalorder %s1669_s30, %s1670_s6  ;;  %v325_v23 = vstv %s4084_s16  ;;  %v3215_v42 = vsel %vm1684_vm6, 1.0, %v3847_v15  ;;  %v1692_v43 = vadd.s32 %v1690_v37, %v4051_v2  ;;  %v3216_v44 = vsel %vm1685_vm7, 1.0, %v3847_v15  ;;  %s4411_s8 = sld [smem:[#allocation4 + %s1657_s1]] }
  0x7b   : > { %3435 = vmatpush3.msra.mxu0 %v4072_v9  ;;  %v4134_v24 = vadd.s32 %v325_v23, %v4061_v5  ;;  %vm1693_vm8 = vcmp.eq.s32.totalorder %v4061_v5, %v1691_v41  ;;  %v333_v48 = vstv %s4286_s11  ;;  %v250_v14 = vand.u32 2147483647, %v242_v10  ;;  %s4367_s25 = scalar_select %p299_p5, %s4826_s28, 16 }
  0x7c   : > { %3446 = vmatprep.subr.mxu0 %v4116_v20  ;;  %3437 = vmatmul.mubr.msk.f32.vlgmr.msra.gmra.mxu0 %vm251_vm0, %v4119_v21  ;;  %s4828_s30 = smov (!%p1671_p12, %s1669_s30), %s1670_s6  ;;  %v3217_v45 = vsel %vm1693_vm8, 1.0, %v3847_v15  ;;  %vm1694_vm9 = vcmp.eq.s32.totalorder %v4061_v5, %v1692_v43  ;;  %v334_v49 = vadd.s32 %v333_v48, %v4061_v5  ;;  %s301_s0 = ssub.s32 %s288_s21, %s4084_s16 }
  0x7d   : > { %3447 = vmatpush3.msra.mxu0 %v4116_v20  ;;  %3450 = vmatprep.mubr.msk.f32.mxu0 %vm251_vm0, %v4092_v16  ;;  %vm4145_vm5 = vcmp.eq.s32.totalorder %v4051_v2, %v4134_v24  ;;  %v3218_v46 = vsel %vm1694_vm9, 1.0, %v3847_v15  ;;  %vm4292_vm10 = vcmp.eq.s32.totalorder %v4044_v1, %v4134_v24  ;;  %v265_v18 = vsel %vm251_vm0, %v250_v14, 0.0  ;;  %s302_s18 = ssub.s32 %s293_s23, %s4286_s11  ;;  %s3849_s24 = smov 1.0  }
  0x7e   : > { %3448 = vmatprep.subr.mxu0 %v4125_v22  ;;  %3425 = vmatprep.subr.msk.mxu1 %vm4145_vm5, %v3848_v28  ;;  %vm4307_vm11 = vcmp.eq.s32.totalorder %v4051_v2, %v334_v49  ;;  %p303_p2 = scmp.lt.s32.totalorder %s301_s0, %s302_s18  ;;  %vm4345_vm12 = vcmp.eq.s32.totalorder %v4044_v1, %v334_v49  ;;  %s1661_s15 = sadd.s32 6, %s4040_s12 }
  0x7f   : > { %3449 = vmatpush3.msra.mxu0 %v4125_v22  ;;  %3426 = vmatpush3.msk.msra.mxu1 %vm4145_vm5, %v3848_v28  ;;  %s1662_s16 = sld [smem:[#allocation3 + %s1661_s15]]  ;;  %p1673_p13 = scmp.lt.s32.totalorder %s4828_s30, 16 }
  0x80   : > { %3460 = vmatprep.subr.mxu0 %v4140_v25  ;;  %3451 = vmatmul.mubr.msk.f32.vlgmr.msra.gmra.mxu0 %vm251_vm0, %v4096_v17  ;;  %s4830_s0 = smov (!%p303_p2, %s301_s0), %s302_s18  ;;  %v1707_v39 = vstv %s4411_s8  ;;  %s1667_s29 = sld [smem:[#allocation4 + %s1661_s15]] }
  0x81   : > { %3461 = vmatpush3.msra.mxu0 %v4140_v25  ;;  %3464 = vmatprep.mubr.msk.f32.mxu0 %vm251_vm0, %v4109_v19  ;;  %p305_p7 = scmp.lt.s32.totalorder %s4830_s0, 16  ;;  %p3156_p10 = scmp.gt.s32.totalorder %s4826_s28, 0 }
  0x82   : > { %3462 = vmatprep.subr.mxu0 %v4151_v27  ;;  %3427 = vmatprep.subr.msk.mxu1 %vm4292_vm10, %v3848_v28  ;;  %s4572_s11 = scalar_select %p1673_p13, %s4828_s30, 16 }
  0x83   : > { %3463 = vmatpush3.msra.mxu0 %v4151_v27  ;;  %3428 = vmatpush3.msk.msra.mxu1 %vm4292_vm10, %v3848_v28  ;;  %s4373_s26 = scalar_select %p305_p7, %s4830_s0, 16 }
  0x84   : > { %3474 = vmatprep.subr.mxu0 %v4163_v29  ;;  %3465 = vmatmul.mubr.msk.f32.vlgmr.msra.gmra.mxu0 %vm251_vm0, %v4119_v21  ;;  %p3160_p0 = scmp.gt.s32.totalorder %s4830_s0, 0  ;;  %p3223_p4 = scmp.gt.s32.totalorder %s4828_s30, 0 }
  0x85   : > { %3475 = vmatpush3.msra.mxu0 %v4163_v29  ;;  %3478 = vmatprep.mubr.msk.f32.mxu0 %vm251_vm0, %v4092_v16  ;;  %s341_s14 = smul.u32 %s4373_s26, %s4367_s25  ;;  %s1675_s12 = ssub.s32 %s1662_s16, %s4395_s20 }
  0x86   : > { %3476 = vmatprep.subr.mxu0 %v4171_v30  ;;  %3439 = vmatprep.subr.msk.mxu1 %vm4307_vm11, %v3848_v28  ;;  %s1676_s6 = ssub.s32 %s1667_s29, %s4411_s8  ;;  %p4658_p3 = pnand %p3160_p0, %p3156_p10 }
  0x87   : > { %3477 = vmatpush3.msra.mxu0 %v4171_v30  ;;  %s342_s22 = scvt.s32.f32 %s341_s14  ;;  %p1677_p11 = scmp.lt.s32.totalorder %s1675_s12, %s1676_s6 }
  0x88   : > { %3488 = vmatprep.subr.mxu0 %v4180_v31  ;;  %3479 = vmatmul.mubr.msk.f32.vlgmr.msra.gmra.mxu0 %vm251_vm0, %v4096_v17  ;;  %s281_s14 = sld [smem:[#allocation5 + %s3908_s9]]  ;;  %p215_p9 = scmp.lt.s32.totalorder %s3908_s9, 1 }
  0x89   : > { %3489 = vmatpush3.msra.mxu0 %v4180_v31  ;;  %3492 = vmatprep.mubr.msk.f32.mxu0 %vm251_vm0, %v4109_v19  ;;  %s343_s17 = smul.f32 4.0, %s342_s22  ;;  %s4832_s12 = smov (!%p1677_p11, %s1675_s12), %s1676_s6 }
  0x8a   : > { %3490 = vmatprep.subr.mxu0 %v4185_v32  ;;  %p1679_p1 = scmp.lt.s32.totalorder %s4832_s12, 16  ;;  %p3227_p6 = scmp.gt.s32.totalorder %s4832_s12, 0 }
  0x8b   : > { %3491 = vmatpush3.msra.mxu0 %v4185_v32  ;;  %s349_s27 = smax.f32 %s3849_s24, %s343_s17  ;;  %s4838_s9 = smov (!%p215_p9, %s3908_s9), 1 }
  0x8c   : > { %3502 = vmatprep.subr.mxu0 %v4195_v34  ;;  %3493 = vmatmul.mubr.msk.f32.vlgmr.msra.gmra.mxu0 %vm251_vm0, %v4119_v21  ;;  %s4579_s19 = scalar_select %p1679_p1, %s4832_s12, 16 }
  0x8d   : > { %3503 = vmatpush3.msra.mxu0 %v4195_v34  ;;  %3506 = vmatprep.mubr.msk.f32.mxu0 %vm251_vm0, %v4092_v16  ;;  %p4696_p8 = pnand %p3227_p6, %p3223_p4 }
  0x8e   : > { %3504 = vmatprep.subr.mxu0 %v4200_v35  ;;  %s1715_s21 = smul.u32 %s4579_s19, %s4572_s11 }
  0x8f   : > { %3505 = vmatpush3.msra.mxu0 %v4200_v35 }
  0x90   : > { %3516 = vmatprep.subr.mxu0 %v4211_v38  ;;  %3507 = vmatmul.mubr.msk.f32.vlgmr.msra.gmra.mxu0 %vm251_vm0, %v4096_v17  ;;  %s1716_s23 = scvt.s32.f32 %s1715_s21 }
  0x91   : > { %3517 = vmatpush3.msra.mxu0 %v4211_v38  ;;  %3520 = vmatprep.mubr.msk.f32.mxu0 %vm251_vm0, %v4109_v19 }
  0x92   : > { %3518 = vmatprep.subr.mxu0 %v4217_v40  ;;  %s1717_s18 = smul.f32 4.0, %s1716_s23 }
  0x93   : > { %3519 = vmatpush3.msra.mxu0 %v4217_v40 }
  0x94   : > { %3530 = vmatprep.subr.mxu0 %v4056_v3  ;;  %3521 = vmatmul.mubr.msk.f32.vlgmr.msra.gmra.mxu0 %vm251_vm0, %v4119_v21  ;;  %s1722_s1 = smax.f32 %s3849_s24, %s1717_s18 }
  0x95   : > { %3531 = vmatpush3.msra.mxu0 %v4056_v3  ;;  %3534 = vmatprep.mubr.msk.f32.mxu0 %vm251_vm0, %v3215_v42  ;;  %v257_v3 = vsel %vm251_vm0, %v246_v60, 0.0  ;;  %v1723_v10 = vstv %s1722_s1 }
  0x96   : > { %3532 = vmatprep.subr.mxu0 %v4059_v4 }
  0x97   : > { %3533 = vmatpush3.msra.mxu0 %v4059_v4  ;;  %v258_v4 = vadd.f32 %v257_v3, %v256_v62 }
  0x98   : > { %3544 = vmatprep.subr.mxu0 %v4064_v6  ;;  %3535 = vmatmul.mubr.msk.f32.vlgmr.msra.gmra.mxu0 %vm251_vm0, %v3216_v44 }
  0x99   : > { %3545 = vmatpush3.msra.mxu0 %v4064_v6  ;;  %3548 = vmatprep.mubr.msk.f32.mxu0 %vm251_vm0, %v3217_v45  ;;  %v241_v6 = vsub.f32 %v4200_v35, %v4217_v40 }
  0x9a   : > { %3546 = vmatprep.subr.mxu0 %v4072_v9 }
  0x9b   : > { %3547 = vmatpush3.msra.mxu0 %v4072_v9  ;;  %v260_v9 = vadd.f32 %v259_v8, %v258_v4  ;;  %v249_v11 = vand.u32 2147483647, %v241_v6 }
  0x9c   : > { %3558 = vmatprep.subr.mxu0 %v4116_v20  ;;  %3549 = vmatmul.mubr.msk.f32.vlgmr.msra.gmra.mxu0 %vm251_vm0, %v3218_v46 }
  0x9d   : > { %3559 = vmatpush3.msra.mxu0 %v4116_v20  ;;  %3562 = vmatprep.mubr.msk.f32.mxu0 %vm251_vm0, %v3215_v42  ;;  %v262_v13 = vadd.f32 %v261_v12, %v260_v9  ;;  %v263_v16 = vsel %vm251_vm0, %v249_v11, 0.0 }
  0x9e   : > { %3560 = vmatprep.subr.mxu0 %v4125_v22 }
  0x9f   : > { %3561 = vmatpush3.msra.mxu0 %v4125_v22  ;;  %v264_v17 = vadd.f32 %v263_v16, %v262_v13 }
  0xa0   : > { %3572 = vmatprep.subr.mxu0 %v4140_v25  ;;  %3563 = vmatmul.mubr.msk.f32.vlgmr.msra.gmra.mxu0 %vm251_vm0, %v3216_v44 }
  0xa1   : > { %3573 = vmatpush3.msra.mxu0 %v4140_v25  ;;  %3576 = vmatprep.mubr.msk.f32.mxu0 %vm251_vm0, %v3217_v45  ;;  %v266_v19 = vadd.f32 %v265_v18, %v264_v17 }
  0xa2   : > { %3574 = vmatprep.subr.mxu0 %v4151_v27 }
  0xa3   : > { %3575 = vmatpush3.msra.mxu0 %v4151_v27  ;;  %267 = vadd.xlane.f32.xlu0 %v266_v19 }
  0xa4   : > { %3586 = vmatprep.subr.mxu0 %v4163_v29  ;;  %3577 = vmatmul.mubr.msk.f32.vlgmr.msra.gmra.mxu0 %vm251_vm0, %v3218_v46 }
  0xa5   : > { %3587 = vmatpush3.msra.mxu0 %v4163_v29  ;;  %3590 = vmatprep.mubr.msk.f32.mxu0 %vm251_vm0, %v3215_v42 }
  0xa6   : > { %3588 = vmatprep.subr.mxu0 %v4171_v30 }
  0xa7   : > { %3589 = vmatpush3.msra.mxu0 %v4171_v30 }
  0xa8   : > { %3600 = vmatprep.subr.mxu0 %v4180_v31  ;;  %3591 = vmatmul.mubr.msk.f32.vlgmr.msra.gmra.mxu0 %vm251_vm0, %v3216_v44 }
  0xa9   : > { %3601 = vmatpush3.msra.mxu0 %v4180_v31  ;;  %3604 = vmatprep.mubr.msk.f32.mxu0 %vm251_vm0, %v3217_v45 }
  0xaa   : > { %3602 = vmatprep.subr.mxu0 %v4185_v32 }
  0xab   : > { %3603 = vmatpush3.msra.mxu0 %v4185_v32 }
  0xac   : > { %3614 = vmatprep.subr.mxu0 %v4195_v34  ;;  %3605 = vmatmul.mubr.msk.f32.vlgmr.msra.gmra.mxu0 %vm251_vm0, %v3218_v46 }
  0xad   : > { %3615 = vmatpush3.msra.mxu0 %v4195_v34  ;;  %3618 = vmatprep.mubr.msk.f32.mxu0 %vm251_vm0, %v3215_v42  ;;  %v1708_v42 = vadd.s32 %v1707_v39, %v4061_v5 }
  0xae   : > { %3616 = vmatprep.subr.mxu0 %v4200_v35 }
  0xaf   : > { %3617 = vmatpush3.msra.mxu0 %v4200_v35  ;;  %v1699_v35 = vstv %s4395_s20  ;;  %vm4482_vm15 = vcmp.eq.s32.totalorder %v4051_v2, %v1708_v42  ;;  %vm4494_vm1 = vcmp.eq.s32.totalorder %v4044_v1, %v1708_v42  ;;  %s282_s20 = scvt.s32.f32 %s281_s14 }
  0xb0   : > { %3628 = vmatprep.subr.mxu0 %v4211_v38  ;;  %3619 = vmatmul.mubr.msk.f32.vlgmr.msra.gmra.mxu0 %vm251_vm0, %v3216_v44  ;;  %v1700_v37 = vadd.s32 %v1699_v35, %v4061_v5  ;;  %v1731_v44 = vstv %s4579_s19 }
  0xb1   : > { %3629 = vmatpush3.msra.mxu0 %v4211_v38  ;;  %3632 = vmatprep.mubr.msk.f32.mxu0 %vm251_vm0, %v3217_v45  ;;  %s4654_s8 = smul.f32 5.0, %s282_s20  ;;  %vm4708_vm8 = vcmp.lt.s32.totalorder %v4061_v5, %v1731_v44 }
  0xb2   : > { %3630 = vmatprep.subr.mxu0 %v4217_v40  ;;  %vm4457_vm13 = vcmp.eq.s32.totalorder %v4051_v2, %v1700_v37  ;;  %vm4470_vm14 = vcmp.eq.s32.totalorder %v4044_v1, %v1700_v37  ;;  %v358_v37 = vstv %s4373_s26 }
  0xb3   : > { %3631 = vmatpush3.msra.mxu0 %v4217_v40  ;;  %v350_v40 = vstv %s349_s27  ;;  %vm4674_vm4 = vcmp.lt.s32.totalorder %v4061_v5, %v358_v37 }
  0xb4   : > { %3633 = vmatmul.mubr.msk.f32.vlgmr.msra.gmra.mxu0 %vm251_vm0, %v3218_v46  ;;  %3702 = vrcp.f32 %v350_v40 }
  0xb5   : > { %3704 = vrcp.f32 %v1723_v10 }
  0xc1   : > { %v3703_v59 = vpop.eup %3702 }
  0xc2   : > { %v3705_v11 = vpop.eup %3704 }
 0x12c   : > { %v268_v47 = vpop.xlane.xlu0 %267 }
 0x12d   : > { %v269_v49 = vrot.slane %v268_v47, 4 }
 0x12f   : > { %v270_v52 = vadd.f32 %v269_v49, %v268_v47 }
 0x131   : > { %v271_v54 = vrot.slane %v270_v52, 2 }
 0x133   : > { %v272_v56 = vadd.f32 %v271_v54, %v270_v52 }
 0x135   : > { %v273_v58 = vrot.slane %v272_v56, 1 }
 0x137   : > { %v274_v61 = vadd.f32 %v273_v58, %v272_v56 }
 0x138   : > { %v3424_v20 = vpop.f32.mrf.mxu0 }
 0x139   : > { %3642 = vpush %v274_v61 }
 0x13a   : > { %v441_v21 = vpop.f32.mrf.mxu0  ;;  %3644 = vpush %v3703_v59 }
 0x13b   : > { %3429 = vmatprep.mubr.msk.f32.mxu1 %vm251_vm0, %v441_v21  ;;  %3646 = vpush %v3705_v11 }
 0x13c   : > { %3430 = vmatmul.mubr.msk.f32.vlgmr.msra.gmra.mxu1 %vm251_vm0, %v3424_v20  ;;  %v3438_v23 = vpop.f32.mrf.mxu0 }
 0x13d   : > { %3440 = vmatpush3.msk.msra.mxu1 %vm4307_vm11, %v3848_v28 }
 0x13e   : > { %3441 = vmatprep.subr.msk.mxu1 %vm4345_vm12, %v3848_v28  ;;  %v603_v24 = vpop.f32.mrf.mxu0 }
 0x13f   : > { %3442 = vmatpush3.msk.msra.mxu1 %vm4345_vm12, %v3848_v28  ;;  %3443 = vmatprep.mubr.msk.f32.mxu1 %vm251_vm0, %v603_v24 }
 0x140   : > { %3453 = vmatprep.subr.msk.mxu1 %vm4145_vm5, %v3848_v28  ;;  %3444 = vmatmul.mubr.msk.f32.vlgmr.msra.gmra.mxu1 %vm251_vm0, %v3438_v23  ;;  %v3452_v25 = vpop.f32.mrf.mxu0 }
 0x141   : > { %3454 = vmatpush3.msk.msra.mxu1 %vm4145_vm5, %v3848_v28 }
 0x142   : > { %3455 = vmatprep.subr.msk.mxu1 %vm4292_vm10, %v3848_v28  ;;  %v765_v27 = vpop.f32.mrf.mxu0 }
 0x143   : > { %3456 = vmatpush3.msk.msra.mxu1 %vm4292_vm10, %v3848_v28  ;;  %3457 = vmatprep.mubr.msk.f32.mxu1 %vm251_vm0, %v765_v27 }
 0x144   : > { %3467 = vmatprep.subr.msk.mxu1 %vm4307_vm11, %v3848_v28  ;;  %3458 = vmatmul.mubr.msk.f32.vlgmr.msra.gmra.mxu1 %vm251_vm0, %v3452_v25  ;;  %v3466_v29 = vpop.f32.mrf.mxu0 }
 0x145   : > { %3468 = vmatpush3.msk.msra.mxu1 %vm4307_vm11, %v3848_v28 }
 0x146   : > { %3469 = vmatprep.subr.msk.mxu1 %vm4345_vm12, %v3848_v28  ;;  %v921_v30 = vpop.f32.mrf.mxu0 }
 0x147   : > { %3470 = vmatpush3.msk.msra.mxu1 %vm4345_vm12, %v3848_v28  ;;  %3471 = vmatprep.mubr.msk.f32.mxu1 %vm251_vm0, %v921_v30 }
 0x148   : > { %3481 = vmatprep.subr.msk.mxu1 %vm4145_vm5, %v3848_v28  ;;  %3472 = vmatmul.mubr.msk.f32.vlgmr.msra.gmra.mxu1 %vm251_vm0, %v3466_v29  ;;  %v3480_v31 = vpop.f32.mrf.mxu0 }
 0x149   : > { %3482 = vmatpush3.msk.msra.mxu1 %vm4145_vm5, %v3848_v28 }
 0x14a   : > { %3483 = vmatprep.subr.msk.mxu1 %vm4292_vm10, %v3848_v28  ;;  %v1083_v32 = vpop.f32.mrf.mxu0 }
 0x14b   : > { %3484 = vmatpush3.msk.msra.mxu1 %vm4292_vm10, %v3848_v28  ;;  %3485 = vmatprep.mubr.msk.f32.mxu1 %vm251_vm0, %v1083_v32 }
 0x14c   : > { %3495 = vmatprep.subr.msk.mxu1 %vm4307_vm11, %v3848_v28  ;;  %3486 = vmatmul.mubr.msk.f32.vlgmr.msra.gmra.mxu1 %vm251_vm0, %v3480_v31  ;;  %v3494_v33 = vpop.f32.mrf.mxu0 }
 0x14d   : > { %3496 = vmatpush3.msk.msra.mxu1 %vm4307_vm11, %v3848_v28 }
 0x14e   : > { %3497 = vmatprep.subr.msk.mxu1 %vm4345_vm12, %v3848_v28  ;;  %v1239_v34 = vpop.f32.mrf.mxu0 }
 0x14f   : > { %3498 = vmatpush3.msk.msra.mxu1 %vm4345_vm12, %v3848_v28  ;;  %3499 = vmatprep.mubr.msk.f32.mxu1 %vm251_vm0, %v1239_v34 }
 0x150   : > { %3509 = vmatprep.subr.msk.mxu1 %vm4145_vm5, %v3848_v28  ;;  %3500 = vmatmul.mubr.msk.f32.vlgmr.msra.gmra.mxu1 %vm251_vm0, %v3494_v33  ;;  %v3508_v36 = vpop.f32.mrf.mxu0 }
 0x151   : > { %3510 = vmatpush3.msk.msra.mxu1 %vm4145_vm5, %v3848_v28 }
 0x152   : > { %3511 = vmatprep.subr.msk.mxu1 %vm4292_vm10, %v3848_v28  ;;  %v1401_v38 = vpop.f32.mrf.mxu0 }
 0x153   : > { %3512 = vmatpush3.msk.msra.mxu1 %vm4292_vm10, %v3848_v28  ;;  %3513 = vmatprep.mubr.msk.f32.mxu1 %vm251_vm0, %v1401_v38 }
 0x154   : > { %3523 = vmatprep.subr.msk.mxu1 %vm4307_vm11, %v3848_v28  ;;  %3514 = vmatmul.mubr.msk.f32.vlgmr.msra.gmra.mxu1 %vm251_vm0, %v3508_v36  ;;  %v3522_v26 = vpop.f32.mrf.mxu0  ;;  %v355_v36 = vstv %s4367_s25  ;;  %s3146_s25 = sshll.u32 %s4838_s9, 3 }
 0x155   : > { %3524 = vmatpush3.msk.msra.mxu1 %vm4307_vm11, %v3848_v28  ;;  %vm4664_vm2 = vcmp.lt.s32.totalorder %v4044_v1, %v355_v36  ;;  %vm4669_vm3 = vcmp.lt.s32.totalorder %v4051_v2, %v355_v36  ;;  %s218_s12 = scalar_lea.vmem %s4782_s5, %s3146_s25 }
 0x156   : > { %3525 = vmatprep.subr.msk.mxu1 %vm4345_vm12, %v3848_v28  ;;  %v1557_v43 = vpop.f32.mrf.mxu0  ;;  %vm360_vm5 = vmand %vm4664_vm2, %vm4674_vm4 }
 0x157   : > { %3526 = vmatpush3.msk.msra.mxu1 %vm4345_vm12, %v3848_v28  ;;  %3527 = vmatprep.mubr.msk.f32.mxu1 %vm251_vm0, %v1557_v43  ;;  %v1728_v43 = vstv %s4572_s11  ;;  %vm361_vm6 = vmand %vm4669_vm3, %vm4674_vm4  ;;  %v3165_v52 = vsel %vm360_vm5, 1.0, %v3847_v15 }
 0x158   : > { %3537 = vmatprep.subr.msk.mxu1 %vm4457_vm13, %v3848_v28  ;;  %3528 = vmatmul.mubr.msk.f32.vlgmr.msra.gmra.mxu1 %vm251_vm0, %v3522_v26  ;;  %v3536_v45 = vpop.f32.mrf.mxu0  ;;  %vm4703_vm7 = vcmp.lt.s32.totalorder %v4051_v2, %v1728_v43  ;;  %vm4721_vm9 = vcmp.lt.s32.totalorder %v4044_v1, %v1728_v43 }
 0x159   : > { %3538 = vmatpush3.msk.msra.mxu1 %vm4457_vm13, %v3848_v28  ;;  %vm1734_vm10 = vmand %vm4703_vm7, %vm4708_vm8 }
 0x15a   : > { %3539 = vmatprep.subr.msk.mxu1 %vm4470_vm14, %v3848_v28  ;;  %v1814_v48 = vpop.f32.mrf.mxu0  ;;  %vm1733_vm11 = vmand %vm4721_vm9, %vm4708_vm8  ;;  %v3233_v10 = vsel %vm1734_vm10, 1.0, %v3847_v15 }
 0x15b   : > { %3540 = vmatpush3.msk.msra.mxu1 %vm4470_vm14, %v3848_v28  ;;  %3541 = vmatprep.mubr.msk.f32.mxu1 %vm251_vm0, %v1814_v48 }
 0x15c   : > { %3551 = vmatprep.subr.msk.mxu1 %vm4482_vm15, %v3848_v28  ;;  %3542 = vmatmul.mubr.msk.f32.vlgmr.msra.gmra.mxu1 %vm251_vm0, %v3536_v45  ;;  %v3550_v51 = vpop.f32.mrf.mxu0 }
 0x15d   : > { %3552 = vmatpush3.msk.msra.mxu1 %vm4482_vm15, %v3848_v28 }
 0x15e   : > { %3553 = vmatprep.subr.msk.mxu1 %vm4494_vm1, %v3848_v28  ;;  %v1976_v53 = vpop.f32.mrf.mxu0 }
 0x15f   : > { %3554 = vmatpush3.msk.msra.mxu1 %vm4494_vm1, %v3848_v28  ;;  %3555 = vmatprep.mubr.msk.f32.mxu1 %vm251_vm0, %v1976_v53  ;;  %v3166_v53 = vsel %vm361_vm6, 1.0, %v3847_v15 }
 0x160   : > { %3565 = vmatprep.subr.msk.mxu1 %vm4457_vm13, %v3848_v28  ;;  %3556 = vmatmul.mubr.msk.f32.vlgmr.msra.gmra.mxu1 %vm251_vm0, %v3550_v51  ;;  %v3564_v55 = vpop.f32.mrf.mxu0 }
 0x161   : > { %3566 = vmatpush3.msk.msra.mxu1 %vm4457_vm13, %v3848_v28 }
 0x162   : > { %3567 = vmatprep.subr.msk.mxu1 %vm4470_vm14, %v3848_v28  ;;  %v2138_v57 = vpop.f32.mrf.mxu0 }
 0x163   : > { %3568 = vmatpush3.msk.msra.mxu1 %vm4470_vm14, %v3848_v28  ;;  %3569 = vmatprep.mubr.msk.f32.mxu1 %vm251_vm0, %v2138_v57 }
 0x164   : > { %3579 = vmatprep.subr.msk.mxu1 %vm4482_vm15, %v3848_v28  ;;  %3570 = vmatmul.mubr.msk.f32.vlgmr.msra.gmra.mxu1 %vm251_vm0, %v3564_v55  ;;  %v3578_v60 = vpop.f32.mrf.mxu0 }
 0x165   : > { %3580 = vmatpush3.msk.msra.mxu1 %vm4482_vm15, %v3848_v28 }
 0x166   : > { %3581 = vmatprep.subr.msk.mxu1 %vm4494_vm1, %v3848_v28  ;;  %v2294_v62 = vpop.f32.mrf.mxu0 }
 0x167   : > { %3582 = vmatpush3.msk.msra.mxu1 %vm4494_vm1, %v3848_v28  ;;  %3583 = vmatprep.mubr.msk.f32.mxu1 %vm251_vm0, %v2294_v62 }
 0x168   : > { %3593 = vmatprep.subr.msk.mxu1 %vm4457_vm13, %v3848_v28  ;;  %3584 = vmatmul.mubr.msk.f32.vlgmr.msra.gmra.mxu1 %vm251_vm0, %v3578_v60  ;;  %v3592_v63 = vpop.f32.mrf.mxu0 }
 0x169   : > { %3594 = vmatpush3.msk.msra.mxu1 %vm4457_vm13, %v3848_v28 }
 0x16a   : > { %3595 = vmatprep.subr.msk.mxu1 %vm4470_vm14, %v3848_v28  ;;  %v2456_v0 = vpop.f32.mrf.mxu0  ;;  %s4650_s22 = spop %3642 }
 0x16b   : > { %3596 = vmatpush3.msk.msra.mxu1 %vm4470_vm14, %v3848_v28  ;;  %3597 = vmatprep.mubr.msk.f32.mxu1 %vm251_vm0, %v2456_v0  ;;  %s3645_s17 = spop %3644  ;;  %s3030_s26 = smul.f32 0.00048828125, %s4650_s22 }
 0x16c   : > { %3607 = vmatprep.subr.msk.mxu1 %vm4482_vm15, %v3848_v28  ;;  %3598 = vmatmul.mubr.msk.f32.vlgmr.msra.gmra.mxu1 %vm251_vm0, %v3592_v63  ;;  %v3606_v3 = vpop.f32.mrf.mxu0  ;;  %s353_s27 = smul.f32 %s3645_s17, %s4654_s8  ;;  %s4680_s28 = spop %3646 }
 0x16d   : > { %3608 = vmatpush3.msk.msra.mxu1 %vm4482_vm15, %v3848_v28  ;;  %s1726_s0 = smul.f32 %s4680_s28, %s4654_s8 }
 0x16e   : > { %3609 = vmatprep.subr.msk.mxu1 %vm4494_vm1, %v3848_v28  ;;  %v2612_v4 = vpop.f32.mrf.mxu0  ;;  %s4834_s27 = smov (%p4658_p3, %s353_s27), 0.0 }
 0x16f   : > { %3610 = vmatpush3.msk.msra.mxu1 %vm4494_vm1, %v3848_v28  ;;  %3611 = vmatprep.mubr.msk.f32.mxu1 %vm251_vm0, %v2612_v4  ;;  %v366_v1 = vstv %s4834_s27  ;;  %s4836_s0 = smov (%p4696_p8, %s1726_s0), 0.0 }
 0x170   : > { %3621 = vmatprep.subr.msk.mxu1 %vm4457_vm13, %v3848_v28  ;;  %3612 = vmatmul.mubr.msk.f32.vlgmr.msra.gmra.mxu1 %vm251_vm0, %v3606_v3  ;;  %v3620_v6 = vpop.f32.mrf.mxu0 }
 0x171   : > { %3622 = vmatpush3.msk.msra.mxu1 %vm4457_vm13, %v3848_v28 }
 0x172   : > { %3623 = vmatprep.subr.msk.mxu1 %vm4470_vm14, %v3848_v28  ;;  %v2774_v7 = vpop.f32.mrf.mxu0 }
 0x173   : > { %3624 = vmatpush3.msk.msra.mxu1 %vm4470_vm14, %v3848_v28  ;;  %3625 = vmatprep.mubr.msk.f32.mxu1 %vm251_vm0, %v2774_v7 }
 0x174   : > { %3635 = vmatprep.subr.msk.mxu1 %vm4482_vm15, %v3848_v28  ;;  %3626 = vmatmul.mubr.msk.f32.vlgmr.msra.gmra.mxu1 %vm251_vm0, %v3620_v6  ;;  %v3634_v8 = vpop.f32.mrf.mxu0 }
 0x175   : > { %3636 = vmatpush3.msk.msra.mxu1 %vm4482_vm15, %v3848_v28 }
 0x176   : > { %3637 = vmatprep.subr.msk.mxu1 %vm4494_vm1, %v3848_v28  ;;  %v2930_v9 = vpop.f32.mrf.mxu0 }
 0x177   : > { %3638 = vmatpush3.msk.msra.mxu1 %vm4494_vm1, %v3848_v28  ;;  %3639 = vmatprep.mubr.msk.f32.mxu1 %vm251_vm0, %v2930_v9 }
 0x178   : > { %3640 = vmatmul.mubr.msk.f32.vlgmr.msra.gmra.mxu1 %vm251_vm0, %v3634_v8 }
 0x1fc   : > { %v4613_v12 = vpop.f32.mrf.mxu1 }
 0x1fe   : > { %v4615_v13 = vpop.f32.mrf.mxu1 }
 0x200   : > { %v4617_v14 = vpop.f32.mrf.mxu1 }
 0x201   : > { %v694_v49 = vsub.f32 %v4613_v12, %v4617_v14 }
 0x202   : > { %v4619_v16 = vpop.f32.mrf.mxu1 }
 0x203   : > { %v693_v55 = vsub.f32 %v4615_v13, %v4619_v16  ;;  %v696_v63 = vand.u32 2147483647, %v694_v49 }
 0x204   : > { %v3459_v28 = vpop.f32.mrf.mxu1 }
 0x205   : > { %v695_v11 = vand.u32 2147483647, %v693_v55 }
 0x206   : > { %v4621_v17 = vpop.f32.mrf.mxu1 }
 0x208   : > { %v3473_v18 = vpop.f32.mrf.mxu1 }
 0x209   : > { %v1012_v45 = vsub.f32 %v3459_v28, %v3473_v18 }
 0x20a   : > { %v4623_v19 = vpop.f32.mrf.mxu1 }
 0x20b   : > { %v1011_v50 = vsub.f32 %v4621_v17, %v4623_v19  ;;  %v1014_v56 = vand.u32 2147483647, %v1012_v45  ;;  %v1739_v19 = vstv %s4836_s0 }
 0x20c   : > { %v4625_v20 = vpop.f32.mrf.mxu1 }
 0x20d   : > { %v1013_v0 = vand.u32 2147483647, %v1011_v50  ;;  %v1016_v12 = vadd.f32 %v1014_v56, %v696_v63 }
 0x20e   : > { %v4627_v21 = vpop.f32.mrf.mxu1 }
 0x210   : > { %v4629_v22 = vpop.f32.mrf.mxu1 }
 0x211   : > { %v1330_v51 = vsub.f32 %v4625_v20, %v4629_v22  ;;  %v1015_v20 = vadd.f32 %v1013_v0, %v695_v11 }
 0x212   : > { %v4631_v23 = vpop.f32.mrf.mxu1 }
 0x213   : > { %v1329_v57 = vsub.f32 %v4627_v21, %v4631_v23  ;;  %v1332_v3 = vand.u32 2147483647, %v1330_v51  ;;  %v3232_v23 = vsel %vm1733_vm11, 1.0, %v3847_v15 }
 0x214   : > { %v4633_v24 = vpop.f32.mrf.mxu1  ;;  %v1740_v40 = vmul.f32 %v3232_v23, %v1739_v19 }
 0x215   : > { %v1331_v13 = vand.u32 2147483647, %v1329_v57  ;;  %v1334_v21 = vadd.f32 %v1332_v3, %v1016_v12 }
 0x216   : > { %v4635_v25 = vpop.f32.mrf.mxu1 }
 0x218   : > { %v4637_v27 = vpop.f32.mrf.mxu1 }
 0x219   : > { %v1648_v58 = vsub.f32 %v4633_v24, %v4637_v27 }
 0x21a   : > { %v4640_v29 = vpop.f32.mrf.mxu1 }
 0x21b   : > { %v1647_v4 = vsub.f32 %v4635_v25, %v4640_v29  ;;  %v1650_v14 = vand.u32 2147483647, %v1648_v58 }
 0x21c   : > { %v4642_v30 = vpop.f32.mrf.mxu1 }
 0x21d   : > { %v1649_v22 = vand.u32 2147483647, %v1647_v4 }
 0x21e   : > { %v4644_v31 = vpop.f32.mrf.mxu1 }
 0x220   : > { %v4646_v32 = vpop.f32.mrf.mxu1 }
 0x221   : > { %v2067_v60 = vsub.f32 %v4642_v30, %v4646_v32  ;;  %v368_v32 = vmul.f32 %v3166_v53, %v366_v1 }
 0x222   : > { %v4648_v33 = vpop.f32.mrf.mxu1 }
 0x223   : > { %v2066_v7 = vsub.f32 %v4644_v31, %v4648_v33  ;;  %v2069_v28 = vand.u32 2147483647, %v2067_v60  ;;  %v1333_v31 = vadd.f32 %v1331_v13, %v1015_v20  ;;  %v1652_v33 = vadd.f32 %v1650_v14, %v1334_v21 }
 0x224   : > { %v3571_v34 = vpop.f32.mrf.mxu1 }
 0x225   : > { %v2068_v25 = vand.u32 2147483647, %v2066_v7  ;;  %v1651_v41 = vadd.f32 %v1649_v22, %v1333_v31  ;;  %v1654_v44 = vmul.f32 %v1652_v33, %v368_v32 }
 0x226   : > { %v2219_v35 = vpop.f32.mrf.mxu1 }
 0x228   : > { %v3585_v38 = vpop.f32.mrf.mxu1 }
 0x229   : > { %v2385_v54 = vsub.f32 %v3571_v34, %v3585_v38  ;;  %v1741_v34 = vmul.f32 %v3233_v10, %v1739_v19 }
 0x22a   : > { %v2375_v26 = vpop.f32.mrf.mxu1 }
 0x22b   : > { %v2384_v61 = vsub.f32 %v2219_v35, %v2375_v26  ;;  %v2387_v8 = vand.u32 2147483647, %v2385_v54  ;;  %v367_v26 = vmul.f32 %v3165_v52, %v366_v1 }
 0x22c   : > { %v3599_v42 = vpop.f32.mrf.mxu1 }
 0x22d   : > { %v2386_v17 = vand.u32 2147483647, %v2384_v61  ;;  %v2389_v27 = vadd.f32 %v2387_v8, %v2069_v28  ;;  %v1653_v47 = vmul.f32 %v1651_v41, %v367_v26 }
 0x22e   : > { %v2537_v46 = vpop.f32.mrf.mxu1 }
 0x22f   : > { %v2388_v36 = vadd.f32 %v2386_v17, %v2068_v25 }
 0x230   : > { %v3613_v2 = vpop.f32.mrf.mxu1 }
 0x231   : > { %v2703_v62 = vsub.f32 %v3599_v42, %v3613_v2 }
 0x232   : > { %v2693_v59 = vpop.f32.mrf.mxu1 }
 0x233   : > { %v2702_v9 = vsub.f32 %v2537_v46, %v2693_v59  ;;  %v2705_v18 = vand.u32 2147483647, %v2703_v62 }
 0x234   : > { %v3627_v6 = vpop.f32.mrf.mxu1 }
 0x235   : > { %v2704_v29 = vand.u32 2147483647, %v2702_v9  ;;  %v2707_v37 = vadd.f32 %v2705_v18, %v2389_v27 }
 0x236   : > { %v2855_v16 = vpop.f32.mrf.mxu1 }
 0x237   : > { %v2706_v42 = vadd.f32 %v2704_v29, %v2388_v36 }
 0x238   : > { %v3641_v24 = vpop.f32.mrf.mxu1 }
 0x239   : > { %v3021_v30 = vsub.f32 %v3627_v6, %v3641_v24 }
 0x23a   : > { %v3011_v35 = vpop.f32.mrf.mxu1 }
 0x23b   : > { %v3023_v38 = vand.u32 2147483647, %v3021_v30  ;;  %v3020_v39 = vsub.f32 %v2855_v16, %v3011_v35 }
 0x23d   : > { %v3025_v43 = vadd.f32 %v3023_v38, %v2707_v37  ;;  %v3022_v15 = vand.u32 2147483647, %v3020_v39 }
 0x23f   : > { %v3027_v45 = vmul.f32 %v3025_v43, %v1741_v34  ;;  %v3024_v46 = vadd.f32 %v3022_v15, %v2706_v42 }
 0x241   : > { %v3026_v48 = vmul.f32 %v3024_v46, %v1740_v40  ;;  %v3029_v49 = vadd.f32 %v3027_v45, %v1654_v44 }
 0x243   : > { %v3028_v50 = vadd.f32 %v3026_v48, %v1653_v47  ;;  %v3032_v2 = vsel %vm251_vm0, %v3029_v49, 0.0 }
 0x245   : > { %v3031_v51 = vsel %vm251_vm0, %v3028_v50, 0.0 }
 0x246   : > { %v3033_v52 = vadd.f32 %v3032_v2, %v3031_v51 }
 0x248   : > { %3034 = vadd.xlane.f32.xlu0 %v3033_v52 }
 0x2d1   : > { %v3035_v53 = vpop.xlane.xlu0 %3034 }
 0x2d2   : > { %v3036_v54 = vrot.slane %v3035_v53, 4 }
 0x2d4   : > { %v3037_v5 = vadd.f32 %v3036_v54, %v3035_v53 }
 0x2d6   : > { %v3038_v55 = vrot.slane %v3037_v5, 2 }
 0x2d8   : > { %v3039_v56 = vadd.f32 %v3038_v55, %v3037_v5 }
 0x2da   : > { %v3040_v57 = vrot.slane %v3039_v56, 1 }
 0x2dc   : > { %v3041_v58 = vadd.f32 %v3040_v57, %v3039_v56 }
 0x2de   : > { %3648 = vpush %v3041_v58 }
 0x30f   : > { %s3649_s15 = spop %3648 }
 0x310   : > { %s3043_s6 = sadd.f32 %s3649_s15, %s3030_s26 }
 0x312   : > { %v3044_v59 = vstv %s3043_s6 }
 0x313   : > { %3045 = vst [vmem:[%s218_s12] sm:$0xff] %v3044_v59 }
 0x314 PF: > { %p32_p12 = scmp.ge.s32.totalorder %s3911_s10, 4   ;;  %s4821_s6 = smov %s3830_s2 }
 0x315   : > { %s4822_s2 = smov %s3834_s7  ;;  %s4823_s7 = smov %s3921_s13 }
 0x316   : > { %s4824_s8 = smov %s3911_s10  ;;  %34 = sbr.rel (!%p32_p12) target bundleno = 40 (0x28), region = 81 }
 0x31b   :  { %3065 = vsyncpa [#allocation7], 1 }
 0x31c   :  { %3067 = vsyncpa [#allocation7 + $0x1], 1 }
 0x31d   :  { %3068 = vsyncpa [#allocation9], 1 }
 0x31e   :  { %3070 = vsyncpa [#allocation9 + $0x1], 1 }

</bundles_post_ra>
